<compile_context>
chip_gen: v6e
topology: v6e:2x2x1
jax: 0.10.0
libtpu: 0.0.40
codegen_flags: <defaults>
</compile_context>

<pallas_src>
import math
import jax
import jax.numpy as jnp
from jax import lax
from jax.experimental import pallas as pl
from jax.experimental.pallas import tpu as pltpu

# ---------------- config (small, consistent with the module) ----------------
B = 2
L = 8                       # seq_len
D_MODEL = 32                # input_dim == d_model -> Identity in-proj + residual
D_STATE = 16
D_CONV = 4
EXPAND = 2
D_INNER = EXPAND * D_MODEL              # 64
DT_RANK = math.ceil(D_MODEL / 16)       # 2
EPS = 1e-5

# ---- row layout of the packed "misc" parameter slab: (MISC_ROWS, D_INNER) ----
MISC_A     = 0                      # rows [0, D_STATE)     : -exp(A_log).T   (16, 64)
MISC_WCONV = D_STATE                # rows [16, 16+D_CONV)  : depthwise conv taps
MISC_BCONV = MISC_WCONV + D_CONV    # 20                    : conv bias
MISC_BDTP  = MISC_BCONV + 1         # 21                    : dt_proj bias
MISC_DP    = MISC_BDTP + 1          # 22                    : D (skip) parameter
MISC_LNG   = MISC_DP + 1            # 23                    : LayerNorm gamma (first D_MODEL lanes)
MISC_LNB   = MISC_LNG + 1           # 24                    : LayerNorm beta
MISC_BOP   = MISC_LNB + 1           # 25                    : output_projection bias
MISC_ROWS  = MISC_BOP + 1           # 26


# ------------------------------- kernel -------------------------------------
def mamba_block_kernel(
    x_ref,        # (B*L, D_MODEL)          batch folded into rows
    w_in_ref,     # (D_MODEL, 2*D_INNER)    mamba in_proj (no bias)
    w_cat_ref,    # (D_INNER, D_INNER + 2*D_STATE)  fused [dt | B | C] projection
    w_out_ref,    # (D_INNER, D_MODEL)      fused out_proj @ output_projection
    misc_ref,     # (MISC_ROWS, D_INNER)    packed small params (see layout above)
    o_ref,        # (B*L, D_MODEL)
):
    BL = B * L

    x = x_ref[...].astype(jnp.float32)                           # (16, 32)
    residual = x

    # ---- unpack the misc slab (static ref slices are free views) ----
    A_T    = misc_ref[MISC_A:MISC_A + D_STATE, :]                 # (16, 64) = -exp(A_log).T
    w_conv = misc_ref[MISC_WCONV:MISC_WCONV + D_CONV, :]          # (4, 64)
    b_conv = misc_ref[MISC_BCONV:MISC_BCONV + 1, :]               # (1, 64)
    b_dtp  = misc_ref[MISC_BDTP:MISC_BDTP + 1, :]                 # (1, 64)
    Dp     = misc_ref[MISC_DP:MISC_DP + 1, :]                     # (1, 64)
    ln_g   = misc_ref[MISC_LNG:MISC_LNG + 1, :D_MODEL]            # (1, 32)
    ln_b   = misc_ref[MISC_LNB:MISC_LNB + 1, :D_MODEL]            # (1, 32)
    b_op   = misc_ref[MISC_BOP:MISC_BOP + 1, :D_MODEL]            # (1, 32)

    # ---------------- LayerNorm(d_model), row-wise over all B*L rows ----------------
    mu = jnp.mean(x, axis=-1, keepdims=True)
    var = jnp.mean(jnp.square(x - mu), axis=-1, keepdims=True)
    xn = (x - mu) * lax.rsqrt(var + EPS) * ln_g + ln_b

    # ---------------- Mamba in_proj: one (16,32)x(32,128) matmul ----------------
    xz = jnp.dot(xn, w_in_ref[...], preferred_element_type=jnp.float32)   # (16, 128)
    xi = xz[:, :D_INNER]                                          # SSM branch  (16, 64)
    z = xz[:, D_INNER:]                                           # gate branch (16, 64)

    # ---- causal depthwise conv1d (kernel D_CONV, pad D_CONV-1, crop L), per batch ----
    # zero-padded temporary + static slices (no per-tap zero-concat copies);
    # per-batch so the causal padding never leaks across the folded batch boundary.
    u_parts = []
    for b in range(B):
        xi_b = xi[b * L:(b + 1) * L, :]                           # (8, 64)
        xpad = jnp.concatenate(
            [jnp.zeros((D_CONV - 1, D_INNER), jnp.float32), xi_b], axis=0)  # (11, 64)
        acc = b_conv
        for k in range(D_CONV):
            acc = acc + xpad[k:k + L, :] * w_conv[k:k + 1, :]
        u_parts.append(acc)
    acc = jnp.concatenate(u_parts, axis=0)                        # (16, 64)
    u = acc * jax.nn.sigmoid(acc)                                 # SiLU -> SSM input

    # ---------------- fused x_proj / dt_proj: one (16,64)x(64,96) matmul ----------------
    proj = jnp.dot(u, w_cat_ref[...], preferred_element_type=jnp.float32)  # (16, 96)
    dt = proj[:, :D_INNER] + b_dtp                                # (16, 64)
    # softplus (PyTorch threshold=20)
    dt = jnp.where(dt > 20.0, dt, jnp.log1p(jnp.exp(jnp.minimum(dt, 20.0))))
    BCT = proj[:, D_INNER:].T                                     # (2*D_STATE, 16): [B ; C] columns per step

    # ---------------- selective scan, lane-major in D_INNER ----------------
    # h: (D_STATE, D_INNER); dt/u rows broadcast along sublanes; B_t/C_t are
    # (D_STATE, 1) columns; reduction over D_STATE is a sublane reduce; each
    # y_t is a full-lane (1, D_INNER) row kept in registers.
    dtu = dt * u                                                  # (16, 64)
    ys = []
    for b in range(B):
        h = jnp.zeros((D_STATE, D_INNER), jnp.float32)
        for t in range(L):
            r = b * L + t
            dA = jnp.exp(dt[r:r + 1, :] * A_T)                    # (16, 64)
            h = dA * h + BCT[:D_STATE, r:r + 1] * dtu[r:r + 1, :]  # (16, 64)
            ys.append(jnp.sum(h * BCT[D_STATE:, r:r + 1], axis=0, keepdims=True))  # (1, 64)
    y = jnp.concatenate(ys, axis=0)                               # (16, 64)

    y = y + u * Dp                                                # skip connection (D)
    y = y * (z * jax.nn.sigmoid(z))                               # gate: y * silu(z)

    # ---- fused out_proj @ output_projection (Dropout(p=0.1)=identity) + residual ----
    out = jnp.dot(y, w_out_ref[...], preferred_element_type=jnp.float32) + b_op
    o_ref[...] = (out + residual).astype(o_ref.dtype)


# ------------------------------- wrapper -------------------------------------
def mamba_block(x, params):
    (ln_g, ln_b, w_in, w_conv, b_conv, w_dt, w_B, w_C,
     w_dtp, b_dtp, A_log, Dp, w_out, w_op, b_op) = params
    Bb, Ll, Dd = x.shape

    # exact algebraic fusions (no nonlinearity between the fused matmuls;
    # dropout is identity at inference)
    w_cat = jnp.concatenate([w_dt @ w_dtp, w_B, w_C], axis=1)      # (D_INNER, D_INNER + 2*D_STATE)
    w_out_fused = w_out @ w_op                                     # (D_INNER, D_MODEL)
    A_neg_T = (-jnp.exp(A_log)).T                                  # (D_STATE, D_INNER)

    def pad_row(v):  # (1, n) -> (1, D_INNER)
        return jnp.pad(v, ((0, 0), (0, D_INNER - v.shape[1])))

    misc = jnp.concatenate(
        [A_neg_T, w_conv, b_conv, b_dtp, Dp,
         pad_row(ln_g), pad_row(ln_b), pad_row(b_op)], axis=0)     # (MISC_ROWS, D_INNER)

    # fold batch into the matmul row dimension; layout plumbing stays in the wrapper
    x2 = x.reshape(Bb * Ll, Dd)

    def full(a):
        return pl.BlockSpec(a.shape, lambda i: (0, 0))

    out2 = pl.pallas_call(
        mamba_block_kernel,
        out_shape=jax.ShapeDtypeStruct((Bb * Ll, D_MODEL), jnp.float32),
        grid_spec=pltpu.PrefetchScalarGridSpec(
            num_scalar_prefetch=0,
            # single invocation: no per-grid-step pipeline overhead on 1-TC chips
            # (v5e/v6e). On v7x one could instead shard the batch over the 2 TCs.
            grid=(1,),
            in_specs=[full(x2), full(w_in), full(w_cat), full(w_out_fused), full(misc)],
            out_specs=pl.BlockSpec((Bb * Ll, D_MODEL), lambda i: (0, 0)),
        ),
        compiler_params=pltpu.CompilerParams(dimension_semantics=("arbitrary",)),
    )(x2, w_in, w_cat, w_out_fused, misc)
    return out2.reshape(Bb, Ll, D_MODEL)


# --------------------------- pure-JAX reference -------------------------------
# (computed from the ORIGINAL unfused parameters to validate the fusions)
def mamba_block_ref(x, params):
    (ln_g, ln_b, w_in, w_conv, b_conv, w_dt, w_B, w_C,
     w_dtp, b_dtp, A_log, Dp, w_out, w_op, b_op) = params
    res = x
    mu = x.mean(-1, keepdims=True)
    var = ((x - mu) ** 2).mean(-1, keepdims=True)
    xn = (x - mu) * lax.rsqrt(var + EPS) * ln_g + ln_b
    xz = xn @ w_in
    xi, z = xz[..., :D_INNER], xz[..., D_INNER:]
    acc = jnp.broadcast_to(b_conv, xi.shape)
    for k in range(D_CONV):
        shift = D_CONV - 1 - k
        if shift == 0:
            xs = xi
        else:
            xs = jnp.concatenate(
                [jnp.zeros((x.shape[0], shift, D_INNER)), xi[:, : L - shift]], axis=1)
        acc = acc + xs * w_conv[k][None, None, :]
    u = jax.nn.silu(acc)
    dt = jax.nn.softplus((u @ w_dt) @ w_dtp + b_dtp)
    Bm, Cm = u @ w_B, u @ w_C
    A = -jnp.exp(A_log)
    dA = jnp.exp(dt[..., None] * A)                          # (B, L, D_INNER, D_STATE)
    dBu = (dt * u)[..., None] * Bm[..., None, :]

    def step(h, inp):
        dA_t, dBu_t, C_t = inp
        h = dA_t * h + dBu_t
        return h, jnp.sum(h * C_t[:, None, :], axis=-1)

    h0 = jnp.zeros((x.shape[0], D_INNER, D_STATE))
    _, ys = lax.scan(step, h0, (dA.transpose(1, 0, 2, 3),
                                dBu.transpose(1, 0, 2, 3),
                                Cm.transpose(1, 0, 2)))
    y = ys.transpose(1, 0, 2) + u * Dp
    y = y * jax.nn.silu(z)
    return (y @ w_out) @ w_op + b_op + res


# --------------------------------- main ---------------------------------------
if __name__ == "__main__":
    key = jax.random.PRNGKey(0)
    kx, *kw = jax.random.split(key, 12)

    def rnd(k, shape, scale):
        return jax.random.normal(k, shape, jnp.float32) * scale

    # deterministic parameter init (shapes follow the module's __init__)
    ln_g = jnp.ones((1, D_MODEL), jnp.float32)
    ln_b = jnp.zeros((1, D_MODEL), jnp.float32)
    w_in = rnd(kw[0], (D_MODEL, 2 * D_INNER), 0.1)
    w_conv = rnd(kw[1], (D_CONV, D_INNER), 0.2)
    b_conv = rnd(kw[2], (1, D_INNER), 0.1)
    w_dt = rnd(kw[3], (D_INNER, DT_RANK), 0.1)
    w_B = rnd(kw[4], (D_INNER, D_STATE), 0.1)
    w_C = rnd(kw[5], (D_INNER, D_STATE), 0.1)
    w_dtp = rnd(kw[6], (DT_RANK, D_INNER), 0.3)
    b_dtp = rnd(kw[7], (1, D_INNER), 0.1)
    A_log = jnp.log(jnp.broadcast_to(
        jnp.arange(1, D_STATE + 1, dtype=jnp.float32)[None, :], (D_INNER, D_STATE)))
    Dp = jnp.ones((1, D_INNER), jnp.float32)
    w_out = rnd(kw[8], (D_INNER, D_MODEL), 0.1)
    w_op = rnd(kw[9], (D_MODEL, D_MODEL), 0.1)
    b_op = rnd(kw[10], (1, D_MODEL), 0.05)

    params = (ln_g, ln_b, w_in, w_conv, b_conv, w_dt, w_B, w_C,
              w_dtp, b_dtp, A_log, Dp, w_out, w_op, b_op)

    x = jax.random.normal(kx, (B, L, D_MODEL), jnp.float32)

    out = mamba_block(x, params)
    out = jax.block_until_ready(out)

    ref = mamba_block_ref(x, params)
    assert out.shape == (B, L, D_MODEL)
    assert jnp.allclose(out, ref, rtol=1e-3, atol=1e-3), \
        f"max abs diff = {jnp.max(jnp.abs(out - ref))}"

    print("KERNEL_OK")
</pallas_src>

<mosaic_0001>
module attributes {stable_mosaic.version = 11 : i64} {
  func.func @mamba_block_kernel(%arg0: i32, %arg1: memref<16x32xf32, #tpu.memory_space<vmem>>, %arg2: memref<32x128xf32, #tpu.memory_space<vmem>>, %arg3: memref<64x96xf32, #tpu.memory_space<vmem>>, %arg4: memref<64x32xf32, #tpu.memory_space<vmem>>, %arg5: memref<26x64xf32, #tpu.memory_space<vmem>>, %arg6: memref<16x32xf32, #tpu.memory_space<vmem>>) attributes {dimension_semantics = [#tpu.dimension_semantics<arbitrary>], iteration_bounds = array<i64: 1>, scalar_prefetch = 0 : i64, scratch_operands = 0 : i64, tpu.core_type = #tpu.core_type<tc>, window_params = [{pipeline_mode = #tpu.pipeline_mode<synchronous>, transform_indices = @transform_0, window_bounds = array<i64: 16, 32>}, {pipeline_mode = #tpu.pipeline_mode<synchronous>, transform_indices = @transform_1, window_bounds = array<i64: 32, 128>}, {pipeline_mode = #tpu.pipeline_mode<synchronous>, transform_indices = @transform_2, window_bounds = array<i64: 64, 96>}, {pipeline_mode = #tpu.pipeline_mode<synchronous>, transform_indices = @transform_3, window_bounds = array<i64: 64, 32>}, {pipeline_mode = #tpu.pipeline_mode<synchronous>, transform_indices = @transform_4, window_bounds = array<i64: 26, 64>}, {pipeline_mode = #tpu.pipeline_mode<synchronous>, transform_indices = @transform_5, window_bounds = array<i64: 16, 32>}]} {
    %c0 = arith.constant 0 : index
    %c0_0 = arith.constant 0 : index
    %0 = vector.load %arg1[%c0, %c0_0] : memref<16x32xf32, #tpu.memory_space<vmem>>, vector<16x32xf32>
    %c0_1 = arith.constant 0 : index
    %c0_2 = arith.constant 0 : index
    %1 = vector.load %arg5[%c0_1, %c0_2] : memref<26x64xf32, #tpu.memory_space<vmem>>, vector<16x64xf32>
    %c16 = arith.constant 16 : index
    %c0_3 = arith.constant 0 : index
    %2 = vector.load %arg5[%c16, %c0_3] : memref<26x64xf32, #tpu.memory_space<vmem>>, vector<4x64xf32>
    %c20 = arith.constant 20 : index
    %c0_4 = arith.constant 0 : index
    %3 = vector.load %arg5[%c20, %c0_4] : memref<26x64xf32, #tpu.memory_space<vmem>>, vector<1x64xf32>
    %c21 = arith.constant 21 : index
    %c0_5 = arith.constant 0 : index
    %4 = vector.load %arg5[%c21, %c0_5] : memref<26x64xf32, #tpu.memory_space<vmem>>, vector<1x64xf32>
    %c22 = arith.constant 22 : index
    %c0_6 = arith.constant 0 : index
    %5 = vector.load %arg5[%c22, %c0_6] : memref<26x64xf32, #tpu.memory_space<vmem>>, vector<1x64xf32>
    %c23 = arith.constant 23 : index
    %c0_7 = arith.constant 0 : index
    %6 = vector.load %arg5[%c23, %c0_7] : memref<26x64xf32, #tpu.memory_space<vmem>>, vector<1x32xf32>
    %c24 = arith.constant 24 : index
    %c0_8 = arith.constant 0 : index
    %7 = vector.load %arg5[%c24, %c0_8] : memref<26x64xf32, #tpu.memory_space<vmem>>, vector<1x32xf32>
    %c25 = arith.constant 25 : index
    %c0_9 = arith.constant 0 : index
    %8 = vector.load %arg5[%c25, %c0_9] : memref<26x64xf32, #tpu.memory_space<vmem>>, vector<1x32xf32>
    %cst = arith.constant dense<0.000000e+00> : vector<16xf32>
    %9 = vector.multi_reduction <add>, %0, %cst [1] : vector<16x32xf32> to vector<16xf32>
    %10 = vector.shape_cast %9 : vector<16xf32> to vector<16x1xf32>
    %cst_10 = arith.constant 3.200000e+01 : f32
    %11 = vector.broadcast %cst_10 : f32 to vector<16x1xf32>
    %12 = arith.divf %10, %11 : vector<16x1xf32>
    %13 = vector.broadcast %12 : vector<16x1xf32> to vector<16x32xf32>
    %14 = arith.subf %0, %13 : vector<16x32xf32>
    %15 = arith.mulf %14, %14 : vector<16x32xf32>
    %cst_11 = arith.constant dense<0.000000e+00> : vector<16xf32>
    %16 = vector.multi_reduction <add>, %15, %cst_11 [1] : vector<16x32xf32> to vector<16xf32>
    %17 = vector.shape_cast %16 : vector<16xf32> to vector<16x1xf32>
    %cst_12 = arith.constant 3.200000e+01 : f32
    %18 = vector.broadcast %cst_12 : f32 to vector<16x1xf32>
    %19 = arith.divf %17, %18 : vector<16x1xf32>
    %20 = vector.broadcast %12 : vector<16x1xf32> to vector<16x32xf32>
    %21 = arith.subf %0, %20 : vector<16x32xf32>
    %cst_13 = arith.constant 9.99999974E-6 : f32
    %22 = vector.broadcast %cst_13 : f32 to vector<16x1xf32>
    %23 = arith.addf %19, %22 : vector<16x1xf32>
    %24 = math.rsqrt %23 : vector<16x1xf32>
    %25 = vector.broadcast %24 : vector<16x1xf32> to vector<16x32xf32>
    %26 = arith.mulf %21, %25 : vector<16x32xf32>
    %27 = vector.broadcast %6 : vector<1x32xf32> to vector<16x32xf32>
    %28 = arith.mulf %26, %27 : vector<16x32xf32>
    %29 = vector.broadcast %7 : vector<1x32xf32> to vector<16x32xf32>
    %30 = arith.addf %28, %29 : vector<16x32xf32>
    %c0_14 = arith.constant 0 : index
    %c0_15 = arith.constant 0 : index
    %31 = vector.load %arg2[%c0_14, %c0_15] : memref<32x128xf32, #tpu.memory_space<vmem>>, vector<32x128xf32>
    %cst_16 = arith.constant dense<0.000000e+00> : vector<16x128xf32>
    %32 = tpu.matmul %30, %31, %cst_16 {dimension_numbers = #tpu.dot_dimension_numbers<[1], [0], [0], [1], [0, 0, 1, 1], [], []>} : vector<16x32xf32>, vector<32x128xf32>, vector<16x128xf32> -> vector<16x128xf32>
    %33 = vector.extract_strided_slice %32 {offsets = [0, 0], sizes = [16, 64], strides = [1, 1]} : vector<16x128xf32> to vector<16x64xf32>
    %34 = vector.extract_strided_slice %32 {offsets = [0, 64], sizes = [16, 64], strides = [1, 1]} : vector<16x128xf32> to vector<16x64xf32>
    %35 = vector.extract_strided_slice %33 {offsets = [0, 0], sizes = [8, 64], strides = [1, 1]} : vector<16x64xf32> to vector<8x64xf32>
    %cst_17 = arith.constant 0.000000e+00 : f32
    %36 = vector.broadcast %cst_17 : f32 to vector<3x64xf32>
    %37 = tpu.concatenate %36, %35 in 0 : vector<3x64xf32>, vector<8x64xf32> -> vector<11x64xf32>
    %38 = vector.extract_strided_slice %37 {offsets = [0, 0], sizes = [8, 64], strides = [1, 1]} : vector<11x64xf32> to vector<8x64xf32>
    %39 = vector.extract_strided_slice %2 {offsets = [0, 0], sizes = [1, 64], strides = [1, 1]} : vector<4x64xf32> to vector<1x64xf32>
    %40 = vector.broadcast %39 : vector<1x64xf32> to vector<8x64xf32>
    %41 = arith.mulf %38, %40 : vector<8x64xf32>
    %42 = vector.broadcast %3 : vector<1x64xf32> to vector<8x64xf32>
    %43 = arith.addf %42, %41 : vector<8x64xf32>
    %44 = vector.extract_strided_slice %37 {offsets = [1, 0], sizes = [8, 64], strides = [1, 1]} : vector<11x64xf32> to vector<8x64xf32>
    %45 = vector.extract_strided_slice %2 {offsets = [1, 0], sizes = [1, 64], strides = [1, 1]} : vector<4x64xf32> to vector<1x64xf32>
    %46 = vector.broadcast %45 : vector<1x64xf32> to vector<8x64xf32>
    %47 = arith.mulf %44, %46 : vector<8x64xf32>
    %48 = arith.addf %43, %47 : vector<8x64xf32>
    %49 = vector.extract_strided_slice %37 {offsets = [2, 0], sizes = [8, 64], strides = [1, 1]} : vector<11x64xf32> to vector<8x64xf32>
    %50 = vector.extract_strided_slice %2 {offsets = [2, 0], sizes = [1, 64], strides = [1, 1]} : vector<4x64xf32> to vector<1x64xf32>
    %51 = vector.broadcast %50 : vector<1x64xf32> to vector<8x64xf32>
    %52 = arith.mulf %49, %51 : vector<8x64xf32>
    %53 = arith.addf %48, %52 : vector<8x64xf32>
    %54 = vector.extract_strided_slice %37 {offsets = [3, 0], sizes = [8, 64], strides = [1, 1]} : vector<11x64xf32> to vector<8x64xf32>
    %55 = vector.extract_strided_slice %2 {offsets = [3, 0], sizes = [1, 64], strides = [1, 1]} : vector<4x64xf32> to vector<1x64xf32>
    %56 = vector.broadcast %55 : vector<1x64xf32> to vector<8x64xf32>
    %57 = arith.mulf %54, %56 : vector<8x64xf32>
    %58 = arith.addf %53, %57 : vector<8x64xf32>
    %59 = vector.extract_strided_slice %33 {offsets = [8, 0], sizes = [8, 64], strides = [1, 1]} : vector<16x64xf32> to vector<8x64xf32>
    %cst_18 = arith.constant 0.000000e+00 : f32
    %60 = vector.broadcast %cst_18 : f32 to vector<3x64xf32>
    %61 = tpu.concatenate %60, %59 in 0 : vector<3x64xf32>, vector<8x64xf32> -> vector<11x64xf32>
    %62 = vector.extract_strided_slice %61 {offsets = [0, 0], sizes = [8, 64], strides = [1, 1]} : vector<11x64xf32> to vector<8x64xf32>
    %63 = vector.extract_strided_slice %2 {offsets = [0, 0], sizes = [1, 64], strides = [1, 1]} : vector<4x64xf32> to vector<1x64xf32>
    %64 = vector.broadcast %63 : vector<1x64xf32> to vector<8x64xf32>
    %65 = arith.mulf %62, %64 : vector<8x64xf32>
    %66 = vector.broadcast %3 : vector<1x64xf32> to vector<8x64xf32>
    %67 = arith.addf %66, %65 : vector<8x64xf32>
    %68 = vector.extract_strided_slice %61 {offsets = [1, 0], sizes = [8, 64], strides = [1, 1]} : vector<11x64xf32> to vector<8x64xf32>
    %69 = vector.extract_strided_slice %2 {offsets = [1, 0], sizes = [1, 64], strides = [1, 1]} : vector<4x64xf32> to vector<1x64xf32>
    %70 = vector.broadcast %69 : vector<1x64xf32> to vector<8x64xf32>
    %71 = arith.mulf %68, %70 : vector<8x64xf32>
    %72 = arith.addf %67, %71 : vector<8x64xf32>
    %73 = vector.extract_strided_slice %61 {offsets = [2, 0], sizes = [8, 64], strides = [1, 1]} : vector<11x64xf32> to vector<8x64xf32>
    %74 = vector.extract_strided_slice %2 {offsets = [2, 0], sizes = [1, 64], strides = [1, 1]} : vector<4x64xf32> to vector<1x64xf32>
    %75 = vector.broadcast %74 : vector<1x64xf32> to vector<8x64xf32>
    %76 = arith.mulf %73, %75 : vector<8x64xf32>
    %77 = arith.addf %72, %76 : vector<8x64xf32>
    %78 = vector.extract_strided_slice %61 {offsets = [3, 0], sizes = [8, 64], strides = [1, 1]} : vector<11x64xf32> to vector<8x64xf32>
    %79 = vector.extract_strided_slice %2 {offsets = [3, 0], sizes = [1, 64], strides = [1, 1]} : vector<4x64xf32> to vector<1x64xf32>
    %80 = vector.broadcast %79 : vector<1x64xf32> to vector<8x64xf32>
    %81 = arith.mulf %78, %80 : vector<8x64xf32>
    %82 = arith.addf %77, %81 : vector<8x64xf32>
    %83 = tpu.concatenate %58, %82 in 0 : vector<8x64xf32>, vector<8x64xf32> -> vector<16x64xf32>
    %84 = arith.negf %83 : vector<16x64xf32>
    %85 = math.exp %84 : vector<16x64xf32>
    %cst_19 = arith.constant 1.000000e+00 : f32
    %86 = vector.broadcast %cst_19 : f32 to vector<16x64xf32>
    %87 = arith.addf %86, %85 : vector<16x64xf32>
    %88 = arith.divf %86, %87 : vector<16x64xf32>
    %89 = arith.mulf %83, %88 : vector<16x64xf32>
    %c0_20 = arith.constant 0 : index
    %c0_21 = arith.constant 0 : index
    %90 = vector.load %arg3[%c0_20, %c0_21] : memref<64x96xf32, #tpu.memory_space<vmem>>, vector<64x96xf32>
    %cst_22 = arith.constant dense<0.000000e+00> : vector<16x96xf32>
    %91 = tpu.matmul %89, %90, %cst_22 {dimension_numbers = #tpu.dot_dimension_numbers<[1], [0], [0], [1], [0, 0, 1, 1], [], []>} : vector<16x64xf32>, vector<64x96xf32>, vector<16x96xf32> -> vector<16x96xf32>
    %92 = vector.extract_strided_slice %91 {offsets = [0, 0], sizes = [16, 64], strides = [1, 1]} : vector<16x96xf32> to vector<16x64xf32>
    %93 = vector.broadcast %4 : vector<1x64xf32> to vector<16x64xf32>
    %94 = arith.addf %92, %93 : vector<16x64xf32>
    %cst_23 = arith.constant 2.000000e+01 : f32
    %95 = vector.broadcast %cst_23 : f32 to vector<16x64xf32>
    %96 = arith.cmpf ogt, %94, %95 : vector<16x64xf32>
    %cst_24 = arith.constant 2.000000e+01 : f32
    %97 = vector.broadcast %cst_24 : f32 to vector<16x64xf32>
    %98 = arith.minimumf %94, %97 : vector<16x64xf32>
    %99 = math.exp %98 : vector<16x64xf32>
    %100 = math.log1p %99 : vector<16x64xf32>
    %101 = arith.select %96, %94, %100 : vector<16x64xi1>, vector<16x64xf32>
    %102 = vector.extract_strided_slice %91 {offsets = [0, 64], sizes = [16, 32], strides = [1, 1]} : vector<16x96xf32> to vector<16x32xf32>
    %103 = tpu.transpose %102, [1, 0] : vector<16x32xf32> -> vector<32x16xf32>
    %104 = arith.mulf %101, %89 : vector<16x64xf32>
    %cst_25 = arith.constant 0.000000e+00 : f32
    %105 = vector.broadcast %cst_25 : f32 to vector<16x64xf32>
    %106 = vector.extract_strided_slice %101 {offsets = [0, 0], sizes = [1, 64], strides = [1, 1]} : vector<16x64xf32> to vector<1x64xf32>
    %107 = vector.broadcast %106 : vector<1x64xf32> to vector<16x64xf32>
    %108 = arith.mulf %107, %1 : vector<16x64xf32>
    %109 = math.exp %108 : vector<16x64xf32>
    %110 = arith.mulf %109, %105 : vector<16x64xf32>
    %111 = vector.extract_strided_slice %103 {offsets = [0, 0], sizes = [16, 1], strides = [1, 1]} : vector<32x16xf32> to vector<16x1xf32>
    %112 = vector.extract_strided_slice %104 {offsets = [0, 0], sizes = [1, 64], strides = [1, 1]} : vector<16x64xf32> to vector<1x64xf32>
    %113 = vector.broadcast %111 : vector<16x1xf32> to vector<16x64xf32>
    %114 = vector.broadcast %112 : vector<1x64xf32> to vector<16x64xf32>
    %115 = arith.mulf %113, %114 : vector<16x64xf32>
    %116 = arith.addf %110, %115 : vector<16x64xf32>
    %117 = vector.extract_strided_slice %103 {offsets = [16, 0], sizes = [16, 1], strides = [1, 1]} : vector<32x16xf32> to vector<16x1xf32>
    %118 = vector.broadcast %117 : vector<16x1xf32> to vector<16x64xf32>
    %119 = arith.mulf %116, %118 : vector<16x64xf32>
    %cst_26 = arith.constant dense<0.000000e+00> : vector<64xf32>
    %120 = vector.multi_reduction <add>, %119, %cst_26 [0] : vector<16x64xf32> to vector<64xf32>
    %121 = vector.shape_cast %120 : vector<64xf32> to vector<1x64xf32>
    %122 = vector.extract_strided_slice %101 {offsets = [1, 0], sizes = [1, 64], strides = [1, 1]} : vector<16x64xf32> to vector<1x64xf32>
    %123 = vector.broadcast %122 : vector<1x64xf32> to vector<16x64xf32>
    %124 = arith.mulf %123, %1 : vector<16x64xf32>
    %125 = math.exp %124 : vector<16x64xf32>
    %126 = arith.mulf %125, %116 : vector<16x64xf32>
    %127 = vector.extract_strided_slice %103 {offsets = [0, 1], sizes = [16, 1], strides = [1, 1]} : vector<32x16xf32> to vector<16x1xf32>
    %128 = vector.extract_strided_slice %104 {offsets = [1, 0], sizes = [1, 64], strides = [1, 1]} : vector<16x64xf32> to vector<1x64xf32>
    %129 = vector.broadcast %127 : vector<16x1xf32> to vector<16x64xf32>
    %130 = vector.broadcast %128 : vector<1x64xf32> to vector<16x64xf32>
    %131 = arith.mulf %129, %130 : vector<16x64xf32>
    %132 = arith.addf %126, %131 : vector<16x64xf32>
    %133 = vector.extract_strided_slice %103 {offsets = [16, 1], sizes = [16, 1], strides = [1, 1]} : vector<32x16xf32> to vector<16x1xf32>
    %134 = vector.broadcast %133 : vector<16x1xf32> to vector<16x64xf32>
    %135 = arith.mulf %132, %134 : vector<16x64xf32>
    %cst_27 = arith.constant dense<0.000000e+00> : vector<64xf32>
    %136 = vector.multi_reduction <add>, %135, %cst_27 [0] : vector<16x64xf32> to vector<64xf32>
    %137 = vector.shape_cast %136 : vector<64xf32> to vector<1x64xf32>
    %138 = vector.extract_strided_slice %101 {offsets = [2, 0], sizes = [1, 64], strides = [1, 1]} : vector<16x64xf32> to vector<1x64xf32>
    %139 = vector.broadcast %138 : vector<1x64xf32> to vector<16x64xf32>
    %140 = arith.mulf %139, %1 : vector<16x64xf32>
    %141 = math.exp %140 : vector<16x64xf32>
    %142 = arith.mulf %141, %132 : vector<16x64xf32>
    %143 = vector.extract_strided_slice %103 {offsets = [0, 2], sizes = [16, 1], strides = [1, 1]} : vector<32x16xf32> to vector<16x1xf32>
    %144 = vector.extract_strided_slice %104 {offsets = [2, 0], sizes = [1, 64], strides = [1, 1]} : vector<16x64xf32> to vector<1x64xf32>
    %145 = vector.broadcast %143 : vector<16x1xf32> to vector<16x64xf32>
    %146 = vector.broadcast %144 : vector<1x64xf32> to vector<16x64xf32>
    %147 = arith.mulf %145, %146 : vector<16x64xf32>
    %148 = arith.addf %142, %147 : vector<16x64xf32>
    %149 = vector.extract_strided_slice %103 {offsets = [16, 2], sizes = [16, 1], strides = [1, 1]} : vector<32x16xf32> to vector<16x1xf32>
    %150 = vector.broadcast %149 : vector<16x1xf32> to vector<16x64xf32>
    %151 = arith.mulf %148, %150 : vector<16x64xf32>
    %cst_28 = arith.constant dense<0.000000e+00> : vector<64xf32>
    %152 = vector.multi_reduction <add>, %151, %cst_28 [0] : vector<16x64xf32> to vector<64xf32>
    %153 = vector.shape_cast %152 : vector<64xf32> to vector<1x64xf32>
    %154 = vector.extract_strided_slice %101 {offsets = [3, 0], sizes = [1, 64], strides = [1, 1]} : vector<16x64xf32> to vector<1x64xf32>
    %155 = vector.broadcast %154 : vector<1x64xf32> to vector<16x64xf32>
    %156 = arith.mulf %155, %1 : vector<16x64xf32>
    %157 = math.exp %156 : vector<16x64xf32>
    %158 = arith.mulf %157, %148 : vector<16x64xf32>
    %159 = vector.extract_strided_slice %103 {offsets = [0, 3], sizes = [16, 1], strides = [1, 1]} : vector<32x16xf32> to vector<16x1xf32>
    %160 = vector.extract_strided_slice %104 {offsets = [3, 0], sizes = [1, 64], strides = [1, 1]} : vector<16x64xf32> to vector<1x64xf32>
    %161 = vector.broadcast %159 : vector<16x1xf32> to vector<16x64xf32>
    %162 = vector.broadcast %160 : vector<1x64xf32> to vector<16x64xf32>
    %163 = arith.mulf %161, %162 : vector<16x64xf32>
    %164 = arith.addf %158, %163 : vector<16x64xf32>
    %165 = vector.extract_strided_slice %103 {offsets = [16, 3], sizes = [16, 1], strides = [1, 1]} : vector<32x16xf32> to vector<16x1xf32>
    %166 = vector.broadcast %165 : vector<16x1xf32> to vector<16x64xf32>
    %167 = arith.mulf %164, %166 : vector<16x64xf32>
    %cst_29 = arith.constant dense<0.000000e+00> : vector<64xf32>
    %168 = vector.multi_reduction <add>, %167, %cst_29 [0] : vector<16x64xf32> to vector<64xf32>
    %169 = vector.shape_cast %168 : vector<64xf32> to vector<1x64xf32>
    %170 = vector.extract_strided_slice %101 {offsets = [4, 0], sizes = [1, 64], strides = [1, 1]} : vector<16x64xf32> to vector<1x64xf32>
    %171 = vector.broadcast %170 : vector<1x64xf32> to vector<16x64xf32>
    %172 = arith.mulf %171, %1 : vector<16x64xf32>
    %173 = math.exp %172 : vector<16x64xf32>
    %174 = arith.mulf %173, %164 : vector<16x64xf32>
    %175 = vector.extract_strided_slice %103 {offsets = [0, 4], sizes = [16, 1], strides = [1, 1]} : vector<32x16xf32> to vector<16x1xf32>
    %176 = vector.extract_strided_slice %104 {offsets = [4, 0], sizes = [1, 64], strides = [1, 1]} : vector<16x64xf32> to vector<1x64xf32>
    %177 = vector.broadcast %175 : vector<16x1xf32> to vector<16x64xf32>
    %178 = vector.broadcast %176 : vector<1x64xf32> to vector<16x64xf32>
    %179 = arith.mulf %177, %178 : vector<16x64xf32>
    %180 = arith.addf %174, %179 : vector<16x64xf32>
    %181 = vector.extract_strided_slice %103 {offsets = [16, 4], sizes = [16, 1], strides = [1, 1]} : vector<32x16xf32> to vector<16x1xf32>
    %182 = vector.broadcast %181 : vector<16x1xf32> to vector<16x64xf32>
    %183 = arith.mulf %180, %182 : vector<16x64xf32>
    %cst_30 = arith.constant dense<0.000000e+00> : vector<64xf32>
    %184 = vector.multi_reduction <add>, %183, %cst_30 [0] : vector<16x64xf32> to vector<64xf32>
    %185 = vector.shape_cast %184 : vector<64xf32> to vector<1x64xf32>
    %186 = vector.extract_strided_slice %101 {offsets = [5, 0], sizes = [1, 64], strides = [1, 1]} : vector<16x64xf32> to vector<1x64xf32>
    %187 = vector.broadcast %186 : vector<1x64xf32> to vector<16x64xf32>
    %188 = arith.mulf %187, %1 : vector<16x64xf32>
    %189 = math.exp %188 : vector<16x64xf32>
    %190 = arith.mulf %189, %180 : vector<16x64xf32>
    %191 = vector.extract_strided_slice %103 {offsets = [0, 5], sizes = [16, 1], strides = [1, 1]} : vector<32x16xf32> to vector<16x1xf32>
    %192 = vector.extract_strided_slice %104 {offsets = [5, 0], sizes = [1, 64], strides = [1, 1]} : vector<16x64xf32> to vector<1x64xf32>
    %193 = vector.broadcast %191 : vector<16x1xf32> to vector<16x64xf32>
    %194 = vector.broadcast %192 : vector<1x64xf32> to vector<16x64xf32>
    %195 = arith.mulf %193, %194 : vector<16x64xf32>
    %196 = arith.addf %190, %195 : vector<16x64xf32>
    %197 = vector.extract_strided_slice %103 {offsets = [16, 5], sizes = [16, 1], strides = [1, 1]} : vector<32x16xf32> to vector<16x1xf32>
    %198 = vector.broadcast %197 : vector<16x1xf32> to vector<16x64xf32>
    %199 = arith.mulf %196, %198 : vector<16x64xf32>
    %cst_31 = arith.constant dense<0.000000e+00> : vector<64xf32>
    %200 = vector.multi_reduction <add>, %199, %cst_31 [0] : vector<16x64xf32> to vector<64xf32>
    %201 = vector.shape_cast %200 : vector<64xf32> to vector<1x64xf32>
    %202 = vector.extract_strided_slice %101 {offsets = [6, 0], sizes = [1, 64], strides = [1, 1]} : vector<16x64xf32> to vector<1x64xf32>
    %203 = vector.broadcast %202 : vector<1x64xf32> to vector<16x64xf32>
    %204 = arith.mulf %203, %1 : vector<16x64xf32>
    %205 = math.exp %204 : vector<16x64xf32>
    %206 = arith.mulf %205, %196 : vector<16x64xf32>
    %207 = vector.extract_strided_slice %103 {offsets = [0, 6], sizes = [16, 1], strides = [1, 1]} : vector<32x16xf32> to vector<16x1xf32>
    %208 = vector.extract_strided_slice %104 {offsets = [6, 0], sizes = [1, 64], strides = [1, 1]} : vector<16x64xf32> to vector<1x64xf32>
    %209 = vector.broadcast %207 : vector<16x1xf32> to vector<16x64xf32>
    %210 = vector.broadcast %208 : vector<1x64xf32> to vector<16x64xf32>
    %211 = arith.mulf %209, %210 : vector<16x64xf32>
    %212 = arith.addf %206, %211 : vector<16x64xf32>
    %213 = vector.extract_strided_slice %103 {offsets = [16, 6], sizes = [16, 1], strides = [1, 1]} : vector<32x16xf32> to vector<16x1xf32>
    %214 = vector.broadcast %213 : vector<16x1xf32> to vector<16x64xf32>
    %215 = arith.mulf %212, %214 : vector<16x64xf32>
    %cst_32 = arith.constant dense<0.000000e+00> : vector<64xf32>
    %216 = vector.multi_reduction <add>, %215, %cst_32 [0] : vector<16x64xf32> to vector<64xf32>
    %217 = vector.shape_cast %216 : vector<64xf32> to vector<1x64xf32>
    %218 = vector.extract_strided_slice %101 {offsets = [7, 0], sizes = [1, 64], strides = [1, 1]} : vector<16x64xf32> to vector<1x64xf32>
    %219 = vector.broadcast %218 : vector<1x64xf32> to vector<16x64xf32>
    %220 = arith.mulf %219, %1 : vector<16x64xf32>
    %221 = math.exp %220 : vector<16x64xf32>
    %222 = arith.mulf %221, %212 : vector<16x64xf32>
    %223 = vector.extract_strided_slice %103 {offsets = [0, 7], sizes = [16, 1], strides = [1, 1]} : vector<32x16xf32> to vector<16x1xf32>
    %224 = vector.extract_strided_slice %104 {offsets = [7, 0], sizes = [1, 64], strides = [1, 1]} : vector<16x64xf32> to vector<1x64xf32>
    %225 = vector.broadcast %223 : vector<16x1xf32> to vector<16x64xf32>
    %226 = vector.broadcast %224 : vector<1x64xf32> to vector<16x64xf32>
    %227 = arith.mulf %225, %226 : vector<16x64xf32>
    %228 = arith.addf %222, %227 : vector<16x64xf32>
    %229 = vector.extract_strided_slice %103 {offsets = [16, 7], sizes = [16, 1], strides = [1, 1]} : vector<32x16xf32> to vector<16x1xf32>
    %230 = vector.broadcast %229 : vector<16x1xf32> to vector<16x64xf32>
    %231 = arith.mulf %228, %230 : vector<16x64xf32>
    %cst_33 = arith.constant dense<0.000000e+00> : vector<64xf32>
    %232 = vector.multi_reduction <add>, %231, %cst_33 [0] : vector<16x64xf32> to vector<64xf32>
    %233 = vector.shape_cast %232 : vector<64xf32> to vector<1x64xf32>
    %cst_34 = arith.constant 0.000000e+00 : f32
    %234 = vector.broadcast %cst_34 : f32 to vector<16x64xf32>
    %235 = vector.extract_strided_slice %101 {offsets = [8, 0], sizes = [1, 64], strides = [1, 1]} : vector<16x64xf32> to vector<1x64xf32>
    %236 = vector.broadcast %235 : vector<1x64xf32> to vector<16x64xf32>
    %237 = arith.mulf %236, %1 : vector<16x64xf32>
    %238 = math.exp %237 : vector<16x64xf32>
    %239 = arith.mulf %238, %234 : vector<16x64xf32>
    %240 = vector.extract_strided_slice %103 {offsets = [0, 8], sizes = [16, 1], strides = [1, 1]} : vector<32x16xf32> to vector<16x1xf32>
    %241 = vector.extract_strided_slice %104 {offsets = [8, 0], sizes = [1, 64], strides = [1, 1]} : vector<16x64xf32> to vector<1x64xf32>
    %242 = vector.broadcast %240 : vector<16x1xf32> to vector<16x64xf32>
    %243 = vector.broadcast %241 : vector<1x64xf32> to vector<16x64xf32>
    %244 = arith.mulf %242, %243 : vector<16x64xf32>
    %245 = arith.addf %239, %244 : vector<16x64xf32>
    %246 = vector.extract_strided_slice %103 {offsets = [16, 8], sizes = [16, 1], strides = [1, 1]} : vector<32x16xf32> to vector<16x1xf32>
    %247 = vector.broadcast %246 : vector<16x1xf32> to vector<16x64xf32>
    %248 = arith.mulf %245, %247 : vector<16x64xf32>
    %cst_35 = arith.constant dense<0.000000e+00> : vector<64xf32>
    %249 = vector.multi_reduction <add>, %248, %cst_35 [0] : vector<16x64xf32> to vector<64xf32>
    %250 = vector.shape_cast %249 : vector<64xf32> to vector<1x64xf32>
    %251 = vector.extract_strided_slice %101 {offsets = [9, 0], sizes = [1, 64], strides = [1, 1]} : vector<16x64xf32> to vector<1x64xf32>
    %252 = vector.broadcast %251 : vector<1x64xf32> to vector<16x64xf32>
    %253 = arith.mulf %252, %1 : vector<16x64xf32>
    %254 = math.exp %253 : vector<16x64xf32>
    %255 = arith.mulf %254, %245 : vector<16x64xf32>
    %256 = vector.extract_strided_slice %103 {offsets = [0, 9], sizes = [16, 1], strides = [1, 1]} : vector<32x16xf32> to vector<16x1xf32>
    %257 = vector.extract_strided_slice %104 {offsets = [9, 0], sizes = [1, 64], strides = [1, 1]} : vector<16x64xf32> to vector<1x64xf32>
    %258 = vector.broadcast %256 : vector<16x1xf32> to vector<16x64xf32>
    %259 = vector.broadcast %257 : vector<1x64xf32> to vector<16x64xf32>
    %260 = arith.mulf %258, %259 : vector<16x64xf32>
    %261 = arith.addf %255, %260 : vector<16x64xf32>
    %262 = vector.extract_strided_slice %103 {offsets = [16, 9], sizes = [16, 1], strides = [1, 1]} : vector<32x16xf32> to vector<16x1xf32>
    %263 = vector.broadcast %262 : vector<16x1xf32> to vector<16x64xf32>
    %264 = arith.mulf %261, %263 : vector<16x64xf32>
    %cst_36 = arith.constant dense<0.000000e+00> : vector<64xf32>
    %265 = vector.multi_reduction <add>, %264, %cst_36 [0] : vector<16x64xf32> to vector<64xf32>
    %266 = vector.shape_cast %265 : vector<64xf32> to vector<1x64xf32>
    %267 = vector.extract_strided_slice %101 {offsets = [10, 0], sizes = [1, 64], strides = [1, 1]} : vector<16x64xf32> to vector<1x64xf32>
    %268 = vector.broadcast %267 : vector<1x64xf32> to vector<16x64xf32>
    %269 = arith.mulf %268, %1 : vector<16x64xf32>
    %270 = math.exp %269 : vector<16x64xf32>
    %271 = arith.mulf %270, %261 : vector<16x64xf32>
    %272 = vector.extract_strided_slice %103 {offsets = [0, 10], sizes = [16, 1], strides = [1, 1]} : vector<32x16xf32> to vector<16x1xf32>
    %273 = vector.extract_strided_slice %104 {offsets = [10, 0], sizes = [1, 64], strides = [1, 1]} : vector<16x64xf32> to vector<1x64xf32>
    %274 = vector.broadcast %272 : vector<16x1xf32> to vector<16x64xf32>
    %275 = vector.broadcast %273 : vector<1x64xf32> to vector<16x64xf32>
    %276 = arith.mulf %274, %275 : vector<16x64xf32>
    %277 = arith.addf %271, %276 : vector<16x64xf32>
    %278 = vector.extract_strided_slice %103 {offsets = [16, 10], sizes = [16, 1], strides = [1, 1]} : vector<32x16xf32> to vector<16x1xf32>
    %279 = vector.broadcast %278 : vector<16x1xf32> to vector<16x64xf32>
    %280 = arith.mulf %277, %279 : vector<16x64xf32>
    %cst_37 = arith.constant dense<0.000000e+00> : vector<64xf32>
    %281 = vector.multi_reduction <add>, %280, %cst_37 [0] : vector<16x64xf32> to vector<64xf32>
    %282 = vector.shape_cast %281 : vector<64xf32> to vector<1x64xf32>
    %283 = vector.extract_strided_slice %101 {offsets = [11, 0], sizes = [1, 64], strides = [1, 1]} : vector<16x64xf32> to vector<1x64xf32>
    %284 = vector.broadcast %283 : vector<1x64xf32> to vector<16x64xf32>
    %285 = arith.mulf %284, %1 : vector<16x64xf32>
    %286 = math.exp %285 : vector<16x64xf32>
    %287 = arith.mulf %286, %277 : vector<16x64xf32>
    %288 = vector.extract_strided_slice %103 {offsets = [0, 11], sizes = [16, 1], strides = [1, 1]} : vector<32x16xf32> to vector<16x1xf32>
    %289 = vector.extract_strided_slice %104 {offsets = [11, 0], sizes = [1, 64], strides = [1, 1]} : vector<16x64xf32> to vector<1x64xf32>
    %290 = vector.broadcast %288 : vector<16x1xf32> to vector<16x64xf32>
    %291 = vector.broadcast %289 : vector<1x64xf32> to vector<16x64xf32>
    %292 = arith.mulf %290, %291 : vector<16x64xf32>
    %293 = arith.addf %287, %292 : vector<16x64xf32>
    %294 = vector.extract_strided_slice %103 {offsets = [16, 11], sizes = [16, 1], strides = [1, 1]} : vector<32x16xf32> to vector<16x1xf32>
    %295 = vector.broadcast %294 : vector<16x1xf32> to vector<16x64xf32>
    %296 = arith.mulf %293, %295 : vector<16x64xf32>
    %cst_38 = arith.constant dense<0.000000e+00> : vector<64xf32>
    %297 = vector.multi_reduction <add>, %296, %cst_38 [0] : vector<16x64xf32> to vector<64xf32>
    %298 = vector.shape_cast %297 : vector<64xf32> to vector<1x64xf32>
    %299 = vector.extract_strided_slice %101 {offsets = [12, 0], sizes = [1, 64], strides = [1, 1]} : vector<16x64xf32> to vector<1x64xf32>
    %300 = vector.broadcast %299 : vector<1x64xf32> to vector<16x64xf32>
    %301 = arith.mulf %300, %1 : vector<16x64xf32>
    %302 = math.exp %301 : vector<16x64xf32>
    %303 = arith.mulf %302, %293 : vector<16x64xf32>
    %304 = vector.extract_strided_slice %103 {offsets = [0, 12], sizes = [16, 1], strides = [1, 1]} : vector<32x16xf32> to vector<16x1xf32>
    %305 = vector.extract_strided_slice %104 {offsets = [12, 0], sizes = [1, 64], strides = [1, 1]} : vector<16x64xf32> to vector<1x64xf32>
    %306 = vector.broadcast %304 : vector<16x1xf32> to vector<16x64xf32>
    %307 = vector.broadcast %305 : vector<1x64xf32> to vector<16x64xf32>
    %308 = arith.mulf %306, %307 : vector<16x64xf32>
    %309 = arith.addf %303, %308 : vector<16x64xf32>
    %310 = vector.extract_strided_slice %103 {offsets = [16, 12], sizes = [16, 1], strides = [1, 1]} : vector<32x16xf32> to vector<16x1xf32>
    %311 = vector.broadcast %310 : vector<16x1xf32> to vector<16x64xf32>
    %312 = arith.mulf %309, %311 : vector<16x64xf32>
    %cst_39 = arith.constant dense<0.000000e+00> : vector<64xf32>
    %313 = vector.multi_reduction <add>, %312, %cst_39 [0] : vector<16x64xf32> to vector<64xf32>
    %314 = vector.shape_cast %313 : vector<64xf32> to vector<1x64xf32>
    %315 = vector.extract_strided_slice %101 {offsets = [13, 0], sizes = [1, 64], strides = [1, 1]} : vector<16x64xf32> to vector<1x64xf32>
    %316 = vector.broadcast %315 : vector<1x64xf32> to vector<16x64xf32>
    %317 = arith.mulf %316, %1 : vector<16x64xf32>
    %318 = math.exp %317 : vector<16x64xf32>
    %319 = arith.mulf %318, %309 : vector<16x64xf32>
    %320 = vector.extract_strided_slice %103 {offsets = [0, 13], sizes = [16, 1], strides = [1, 1]} : vector<32x16xf32> to vector<16x1xf32>
    %321 = vector.extract_strided_slice %104 {offsets = [13, 0], sizes = [1, 64], strides = [1, 1]} : vector<16x64xf32> to vector<1x64xf32>
    %322 = vector.broadcast %320 : vector<16x1xf32> to vector<16x64xf32>
    %323 = vector.broadcast %321 : vector<1x64xf32> to vector<16x64xf32>
    %324 = arith.mulf %322, %323 : vector<16x64xf32>
    %325 = arith.addf %319, %324 : vector<16x64xf32>
    %326 = vector.extract_strided_slice %103 {offsets = [16, 13], sizes = [16, 1], strides = [1, 1]} : vector<32x16xf32> to vector<16x1xf32>
    %327 = vector.broadcast %326 : vector<16x1xf32> to vector<16x64xf32>
    %328 = arith.mulf %325, %327 : vector<16x64xf32>
    %cst_40 = arith.constant dense<0.000000e+00> : vector<64xf32>
    %329 = vector.multi_reduction <add>, %328, %cst_40 [0] : vector<16x64xf32> to vector<64xf32>
    %330 = vector.shape_cast %329 : vector<64xf32> to vector<1x64xf32>
    %331 = vector.extract_strided_slice %101 {offsets = [14, 0], sizes = [1, 64], strides = [1, 1]} : vector<16x64xf32> to vector<1x64xf32>
    %332 = vector.broadcast %331 : vector<1x64xf32> to vector<16x64xf32>
    %333 = arith.mulf %332, %1 : vector<16x64xf32>
    %334 = math.exp %333 : vector<16x64xf32>
    %335 = arith.mulf %334, %325 : vector<16x64xf32>
    %336 = vector.extract_strided_slice %103 {offsets = [0, 14], sizes = [16, 1], strides = [1, 1]} : vector<32x16xf32> to vector<16x1xf32>
    %337 = vector.extract_strided_slice %104 {offsets = [14, 0], sizes = [1, 64], strides = [1, 1]} : vector<16x64xf32> to vector<1x64xf32>
    %338 = vector.broadcast %336 : vector<16x1xf32> to vector<16x64xf32>
    %339 = vector.broadcast %337 : vector<1x64xf32> to vector<16x64xf32>
    %340 = arith.mulf %338, %339 : vector<16x64xf32>
    %341 = arith.addf %335, %340 : vector<16x64xf32>
    %342 = vector.extract_strided_slice %103 {offsets = [16, 14], sizes = [16, 1], strides = [1, 1]} : vector<32x16xf32> to vector<16x1xf32>
    %343 = vector.broadcast %342 : vector<16x1xf32> to vector<16x64xf32>
    %344 = arith.mulf %341, %343 : vector<16x64xf32>
    %cst_41 = arith.constant dense<0.000000e+00> : vector<64xf32>
    %345 = vector.multi_reduction <add>, %344, %cst_41 [0] : vector<16x64xf32> to vector<64xf32>
    %346 = vector.shape_cast %345 : vector<64xf32> to vector<1x64xf32>
    %347 = vector.extract_strided_slice %101 {offsets = [15, 0], sizes = [1, 64], strides = [1, 1]} : vector<16x64xf32> to vector<1x64xf32>
    %348 = vector.broadcast %347 : vector<1x64xf32> to vector<16x64xf32>
    %349 = arith.mulf %348, %1 : vector<16x64xf32>
    %350 = math.exp %349 : vector<16x64xf32>
    %351 = arith.mulf %350, %341 : vector<16x64xf32>
    %352 = vector.extract_strided_slice %103 {offsets = [0, 15], sizes = [16, 1], strides = [1, 1]} : vector<32x16xf32> to vector<16x1xf32>
    %353 = vector.extract_strided_slice %104 {offsets = [15, 0], sizes = [1, 64], strides = [1, 1]} : vector<16x64xf32> to vector<1x64xf32>
    %354 = vector.broadcast %352 : vector<16x1xf32> to vector<16x64xf32>
    %355 = vector.broadcast %353 : vector<1x64xf32> to vector<16x64xf32>
    %356 = arith.mulf %354, %355 : vector<16x64xf32>
    %357 = arith.addf %351, %356 : vector<16x64xf32>
    %358 = vector.extract_strided_slice %103 {offsets = [16, 15], sizes = [16, 1], strides = [1, 1]} : vector<32x16xf32> to vector<16x1xf32>
    %359 = vector.broadcast %358 : vector<16x1xf32> to vector<16x64xf32>
    %360 = arith.mulf %357, %359 : vector<16x64xf32>
    %cst_42 = arith.constant dense<0.000000e+00> : vector<64xf32>
    %361 = vector.multi_reduction <add>, %360, %cst_42 [0] : vector<16x64xf32> to vector<64xf32>
    %362 = vector.shape_cast %361 : vector<64xf32> to vector<1x64xf32>
    %363 = tpu.concatenate %121, %137, %153, %169, %185, %201, %217, %233, %250, %266, %282, %298, %314, %330, %346, %362 in 0 : vector<1x64xf32>, vector<1x64xf32>, vector<1x64xf32>, vector<1x64xf32>, vector<1x64xf32>, vector<1x64xf32>, vector<1x64xf32>, vector<1x64xf32>, vector<1x64xf32>, vector<1x64xf32>, vector<1x64xf32>, vector<1x64xf32>, vector<1x64xf32>, vector<1x64xf32>, vector<1x64xf32>, vector<1x64xf32> -> vector<16x64xf32>
    %364 = vector.broadcast %5 : vector<1x64xf32> to vector<16x64xf32>
    %365 = arith.mulf %89, %364 : vector<16x64xf32>
    %366 = arith.addf %363, %365 : vector<16x64xf32>
    %367 = arith.negf %34 : vector<16x64xf32>
    %368 = math.exp %367 : vector<16x64xf32>
    %cst_43 = arith.constant 1.000000e+00 : f32
    %369 = vector.broadcast %cst_43 : f32 to vector<16x64xf32>
    %370 = arith.addf %369, %368 : vector<16x64xf32>
    %371 = arith.divf %369, %370 : vector<16x64xf32>
    %372 = arith.mulf %34, %371 : vector<16x64xf32>
    %373 = arith.mulf %366, %372 : vector<16x64xf32>
    %c0_44 = arith.constant 0 : index
    %c0_45 = arith.constant 0 : index
    %374 = vector.load %arg4[%c0_44, %c0_45] : memref<64x32xf32, #tpu.memory_space<vmem>>, vector<64x32xf32>
    %cst_46 = arith.constant dense<0.000000e+00> : vector<16x32xf32>
    %375 = tpu.matmul %373, %374, %cst_46 {dimension_numbers = #tpu.dot_dimension_numbers<[1], [0], [0], [1], [0, 0, 1, 1], [], []>} : vector<16x64xf32>, vector<64x32xf32>, vector<16x32xf32> -> vector<16x32xf32>
    %376 = vector.broadcast %8 : vector<1x32xf32> to vector<16x32xf32>
    %377 = arith.addf %375, %376 : vector<16x32xf32>
    %378 = arith.addf %377, %0 : vector<16x32xf32>
    %c0_47 = arith.constant 0 : index
    %c0_48 = arith.constant 0 : index
    %379 = vector.load %arg6[%c0_47, %c0_48] : memref<16x32xf32, #tpu.memory_space<vmem>>, vector<16x32xf32>
    tpu.vector_store %arg6[%c0_47, %c0_48], %378 {strides = array<i32>} : memref<16x32xf32, #tpu.memory_space<vmem>>, vector<16x32xf32>,
    return
  }
  func.func @transform_0(%arg0: i32) -> (i32, i32) {
    %c0_i32 = arith.constant 0 : i32
    %c0_i32_0 = arith.constant 0 : i32
    %c0_i32_1 = arith.constant 0 : i32
    return %c0_i32, %c0_i32_0 : i32, i32
  }
  func.func @transform_1(%arg0: i32) -> (i32, i32) {
    %c0_i32 = arith.constant 0 : i32
    %c0_i32_0 = arith.constant 0 : i32
    %c0_i32_1 = arith.constant 0 : i32
    return %c0_i32, %c0_i32_0 : i32, i32
  }
  func.func @transform_2(%arg0: i32) -> (i32, i32) {
    %c0_i32 = arith.constant 0 : i32
    %c0_i32_0 = arith.constant 0 : i32
    %c0_i32_1 = arith.constant 0 : i32
    return %c0_i32, %c0_i32_0 : i32, i32
  }
  func.func @transform_3(%arg0: i32) -> (i32, i32) {
    %c0_i32 = arith.constant 0 : i32
    %c0_i32_0 = arith.constant 0 : i32
    %c0_i32_1 = arith.constant 0 : i32
    return %c0_i32, %c0_i32_0 : i32, i32
  }
  func.func @transform_4(%arg0: i32) -> (i32, i32) {
    %c0_i32 = arith.constant 0 : i32
    %c0_i32_0 = arith.constant 0 : i32
    %c0_i32_1 = arith.constant 0 : i32
    return %c0_i32, %c0_i32_0 : i32, i32
  }
  func.func @transform_5(%arg0: i32) -> (i32, i32) {
    %c0_i32 = arith.constant 0 : i32
    %c0_i32_0 = arith.constant 0 : i32
    %c0_i32_1 = arith.constant 0 : i32
    return %c0_i32, %c0_i32_0 : i32, i32
  }
}

</mosaic_0001>

<bundles_post_ra>
// kernel: tpu_custom_call.1
= control target key start
LH: loop header
LB: loop body
LE: loop exit
PB: predicated region body
PF: predicated region fallthrough
CT: control target
= control target key end

     0   :  { %10 = vsyncpa [#allocation3], 0  ;;  %s2505_s0 = inlined_call_operand.hbm [shape: f32[16,32], index: 0, kind: input, shape index: {}]   ;;  %s2506_s1 = inlined_call_operand.vmem [shape: f32[32,128], index: 1, kind: input, shape index: {}]   ;;  %s2507_s2 = inlined_call_operand.vmem [shape: f32[64,96], index: 2, kind: input, shape index: {}]   ;;  %s2508_s3 = inlined_call_operand.vmem [shape: f32[64,32], index: 3, kind: input, shape index: {}]   ;;  %s2509_s4 = inlined_call_operand.hbm [shape: f32[26,64], index: 4, kind: input, shape index: {}]   ;;  %s2510_s5 = inlined_call_operand.hbm [shape: f32[16,32], index: 5, kind: output, shape index: {}]  }
   0x1   :  { %11 = vsyncpa [#allocation6], 0 }
   0x2   :  { %12 = vsyncpa [#allocation4], 0  ;;  %s1713_s18 = smov [#allocation2]  }
   0x3   :  { %s18_s19 = sshll.u32 %s1713_s18, 4  ;;  %s19_s19 = int_to_ptr.vmem [resolvable:$true] %s18_s19 }
   0x4   :  { %s1655_s20 = scalar_lea.vmem %s19_s19, 256  ;;  %p1660_p1 = scmp.lt.s32.totalorder %s19_s19, %s19_s19 }
   0x5   :  { %p1656_p0 = scmp.ne.s32.totalorder %s19_s19, %s1655_s20  ;;  %p1661_p2 = scmp.lt.s32.totalorder %s1655_s20, %s1655_s20 }
   0x7   :  { %p1662_p3 = por %p1661_p2, %p1660_p1 }
   0x9   :  { %p1663_p4 = pnand %p1662_p3, %p1656_p0 }
   0xb   :  { %1666 = shalt.err (!%p1663_p4)
}
   0xc   :  { %s1714_s21 = smov 128   ;;  %s1715_s22 = smov 8  }
   0xd   :  { %24 = dma.hbm_to_vmem [thread:$0]  %s2505_s0, 256, %s19_s19, [#allocation3], %s1714_s21, %s1714_s21, %s1715_s22  }
   0xe   :  { %s1716_s25 = smov [#allocation5]  }
   0xf   :  { %s36_s26 = sshll.u32 %s1716_s25, 4  ;;  %s37_s26 = int_to_ptr.vmem [resolvable:$true] %s36_s26 }
  0x10   :  { %s1675_s27 = scalar_lea.vmem %s37_s26, 512  ;;  %p1680_p6 = scmp.lt.s32.totalorder %s37_s26, %s37_s26 }
  0x11   :  { %p1676_p5 = scmp.ne.s32.totalorder %s37_s26, %s1675_s27  ;;  %p1681_p7 = scmp.lt.s32.totalorder %s1675_s27, %s1675_s27 }
  0x13   :  { %p1682_p8 = por %p1681_p7, %p1680_p6 }
  0x15   :  { %p1683_p9 = pnand %p1682_p8, %p1676_p5 }
  0x17   :  { %1686 = shalt.err (!%p1683_p9)
}
  0x18   :  { %42 = dma.hbm_to_vmem [thread:$0]  %s2509_s4, 512, %s37_s26, [#allocation6], %s1714_s21, %s1714_s21, %s1715_s22  }
  0x19   :  { %1707 = dma.done.wait [#allocation3], 256  }
  0x1a   :  { %1708 = vsyncadd [#allocation3], 4294967040 }
  0x1b   :  { %1709 = dma.done.wait [#allocation6], 512  }
  0x1c   :  { %1710 = vsyncadd [#allocation6], 4294966784  ;;  %vm60_vm0 = vcmask 261120   ;;  %v49_v0 = vld [vmem:[#allocation2] sm:$0xff]  ;;  %v50_v1 = vld [vmem:[#allocation2 + $0x8] sm:$0xff]  ;;  %v190_v42 = vlaneseq  ;;  %vm188_vm1 = vcmask 1042432  }
  0x1d   :  { %v61_v2 = vsel %vm60_vm0, %v49_v0, 0.0  ;;  %v64_v3 = vsel %vm60_vm0, %v50_v1, 0.0  ;;  %v103_v14 = vld [vmem:[%s2506_s1 + $0x18] sm:$0xff]  ;;  %v102_v15 = vld [vmem:[%s2506_s1 + $0x10] sm:$0xff]  ;;  %v101_v16 = vld [vmem:[%s2506_s1 + $0x8] sm:$0xff]  ;;  %vm208_vm2 = vcmask 1046528  }
  0x1e   :  { %62 = vadd.xlane.f32.xlu0 %v61_v2  ;;  %1417 = vmatprep.subr.mxu0 %v103_v14  ;;  %v100_v17 = vld [vmem:[%s2506_s1] sm:$0xff]  ;;  %v1376_v27 = vld [vmem:[#allocation5 + $0x18] ss:$0 sm:$0xff]  ;;  %v296_v34 = vld [vmem:[%s2507_s2 + $0x38] sm:$0xff]  ;;  %v1819_v43 = vshrl.u32 %v190_v42, 7  ;;  %vm222_vm3 = vcmask 1045504  }
  0x1f   :  { %1418 = vmatpush3.msra.mxu0 %v103_v14  ;;  %v1375_v25 = vld [vmem:[#allocation5 + $0x17] ss:$0 sm:$0xff]  ;;  %v295_v35 = vld [vmem:[%s2507_s2 + $0x30] sm:$0xff]  ;;  %1428 = vmatprep.subr.mxu1 %v296_v34  ;;  %v294_v36 = vld [vmem:[%s2507_s2 + $0x28] sm:$0xff]  ;;  %vm236_vm4 = vcmask 1044480   ;;  %vm297_vm5 = vcmask 523264  }
  0x20   :  { %1419 = vmatprep.subr.mxu0 %v102_v15  ;;  %1429 = vmatpush3.msra.mxu1 %v296_v34  ;;  %v293_v37 = vld [vmem:[%s2507_s2 + $0x20] sm:$0xff]  ;;  %v292_v38 = vld [vmem:[%s2507_s2 + $0x18] sm:$0xff]  ;;  %v291_v39 = vld [vmem:[%s2507_s2 + $0x10] sm:$0xff]  ;;  %v1822_v44 = vsub.s32 1, %v1819_v43  ;;  %v1825_v45 = vsub.s32 2, %v1819_v43  ;;  %v1828_v47 = vsub.s32 0, %v1819_v43 }
  0x21   :  { %1420 = vmatpush3.msra.mxu0 %v102_v15  ;;  %1430 = vmatprep.subr.mxu1 %v295_v35  ;;  %v290_v40 = vld [vmem:[%s2507_s2 + $0x8] sm:$0xff]  ;;  %v289_v41 = vld [vmem:[%s2507_s2] sm:$0xff]  ;;  %v1831_v48 = vsub.s32 3, %v1819_v43  ;;  %s1718_s2 = smov 64   ;;  %vm1211_vm10 = vcmask 1040384   ;;  %vm1213_vm11 = vcmask 1041408  }
  0x22   :  { %65 = vadd.xlane.f32.xlu0 %v64_v3  ;;  %1421 = vmatprep.subr.mxu0 %v101_v16  ;;  %v53_v46 = vld [vmem:[#allocation5 + $0x10] sm:$0xf]  ;;  %v1379_v62 = vld [vmem:[#allocation5 + $0x14] ss:$0 sm:$0xff]  ;;  %vm1216_vm12 = vcmask 1043456  }
  0x23   :  { %1422 = vmatpush3.msra.mxu0 %v101_v16  ;;  %1431 = vmatpush3.msra.mxu1 %v295_v35  ;;  %v203_v49 = vrot.slane %v53_v46, %v1822_v44  ;;  %v217_v50 = vrot.slane %v53_v46, %v1825_v45  ;;  %v193_v52 = vrot.slane %v53_v46, %v1828_v47 }
  0x24   :  { %1423 = vmatprep.subr.mxu0 %v100_v17  ;;  %1432 = vmatprep.subr.mxu1 %v294_v36  ;;  %v231_v53 = vrot.slane %v53_v46, %v1831_v48 }
  0x25   :  { %1424 = vmatpush3.msra.mxu0 %v100_v17  ;;  %1433 = vmatpush3.msra.mxu1 %v294_v36 }
  0x26   :  { %1434 = vmatprep.subr.mxu1 %v293_v37 }
  0x27   :  { %1435 = vmatpush3.msra.mxu1 %v293_v37 }
  0x28   :  { %1436 = vmatprep.subr.mxu1 %v292_v38 }
  0x29   :  { %1437 = vmatpush3.msra.mxu1 %v292_v38 }
  0x2a   :  { %1438 = vmatprep.subr.mxu1 %v291_v39 }
  0x2b   :  { %1439 = vmatpush3.msra.mxu1 %v291_v39 }
  0x2c   :  { %1440 = vmatprep.subr.mxu1 %v290_v40 }
  0x2d   :  { %1441 = vmatpush3.msra.mxu1 %v290_v40 }
  0x2e   :  { %1442 = vmatprep.subr.mxu1 %v289_v41 }
  0x2f   :  { %1443 = vmatpush3.msra.mxu1 %v289_v41 }
  0xa7   :  { %v63_v4 = vpop.xlane.xlu0 %62 }
  0xa8   :  { %v68_v5 = vmul.f32 0.03125, %v63_v4 }
  0xaa   :  { %v70_v6 = vsub.f32 %v49_v0, %v68_v5 }
  0xab   :  { %v66_v7 = vpop.xlane.xlu0 %65 }
  0xac   :  { %v69_v8 = vmul.f32 0.03125, %v66_v7  ;;  %v72_v9 = vmul.f32 %v70_v6, %v70_v6 }
  0xae   :  { %v71_v10 = vsub.f32 %v50_v1, %v69_v8  ;;  %v74_v11 = vsel %vm60_vm0, %v72_v9, 0.0 }
  0xaf   :  { %75 = vadd.xlane.f32.xlu1 %v74_v11 }
  0xb0   :  { %v73_v12 = vmul.f32 %v71_v10, %v71_v10 }
  0xb2   :  { %v77_v13 = vsel %vm60_vm0, %v73_v12, 0.0 }
  0xb3   :  { %78 = vadd.xlane.f32.xlu1 %v77_v13 }
 0x138   :  { %v76_v18 = vpop.xlane.xlu1 %75 }
 0x139   :  { %v80_v19 = vmul.f32 0.03125, %v76_v18 }
 0x13b   :  { %v82_v20 = vadd.f32 1e-05, %v80_v19 }
 0x13c   :  { %v79_v21 = vpop.xlane.xlu1 %78 }
 0x13d   :  { %1553 = vrsqrt.f32 %v82_v20  ;;  %v81_v22 = vmul.f32 0.03125, %v79_v21 }
 0x13f   :  { %v83_v23 = vadd.f32 1e-05, %v81_v22 }
 0x141   :  { %1555 = vrsqrt.f32 %v83_v23 }
 0x14a   :  { %v1554_v24 = vpop.eup %1553 }
 0x14b   :  { %v86_v26 = vmul.f32 %v1554_v24, %v70_v6 }
 0x14d   :  { %v92_v28 = vmul.f32 %v1375_v25, %v86_v26 }
 0x14e   :  { %v1556_v29 = vpop.eup %1555 }
 0x14f   :  { %v87_v30 = vmul.f32 %v1556_v29, %v71_v10  ;;  %v98_v31 = vadd.f32 %v1376_v27, %v92_v28 }
 0x151   :  { %v93_v32 = vmul.f32 %v1375_v25, %v87_v30  ;;  %1425 = vmatprep.mubr.msk.f32.mxu0 %vm60_vm0, %v98_v31 }
 0x153   :  { %v99_v33 = vadd.f32 %v1376_v27, %v93_v32 }
 0x155   :  { %1426 = vmatmul.mubr.msk.f32.vlgmr.msra.gmra.mxu0 %vm60_vm0, %v99_v33 }
 0x215   :  { %v1835_v51 = vpop.f32.mrf.mxu0 }
 0x216   :  { %v243_v54 = vrot.slane %v1835_v51, 5 }
 0x217   :  { %v1840_v55 = vpop.f32.mrf.mxu0 }
 0x218   :  { %v245_v56 = vsel %vm188_vm1, 0.0, %v243_v54  ;;  %v249_v57 = vmul.f32 %v243_v54, %v203_v49  ;;  %v258_v58 = vmul.f32 %v243_v54, %v217_v50  ;;  %v267_v63 = vmul.f32 %v243_v54, %v231_v53 }
 0x219   :  { %v246_v59 = vmul.f32 %v245_v56, %v193_v52  ;;  %v248_v60 = vmul.f32 %v245_v56, %v203_v49  ;;  %v257_v61 = vmul.f32 %v245_v56, %v217_v50  ;;  %v186_v0 = vrot.slane %v1840_v55, 5 }
 0x21a   :  { %v253_v2 = vrot.slane %v249_v57, 1  ;;  %v262_v4 = vrot.slane %v258_v58, 2  ;;  %v271_v20 = vrot.slane %v267_v63, 3  ;;  %v266_v22 = vmul.f32 %v245_v56, %v231_v53 }
 0x21b   :  { %v252_v1 = vrot.slane %v248_v60, 1  ;;  %v261_v3 = vrot.slane %v257_v61, 2  ;;  %v189_v5 = vsel %vm188_vm1, 0.0, %v186_v0  ;;  %v205_v6 = vmul.f32 %v203_v49, %v186_v0 }
 0x21c   :  { %v219_v7 = vmul.f32 %v217_v50, %v186_v0  ;;  %v247_v8 = vadd.f32 %v1379_v62, %v246_v59  ;;  %v204_v9 = vmul.f32 %v203_v49, %v189_v5  ;;  %v233_v10 = vmul.f32 %v231_v53, %v186_v0 }
 0x21d   :  { %v194_v11 = vmul.f32 %v193_v52, %v189_v5  ;;  %v218_v12 = vmul.f32 %v217_v50, %v189_v5  ;;  %v210_v13 = vrot.slane %v205_v6, 1  ;;  %v232_v15 = vmul.f32 %v231_v53, %v189_v5 }
 0x21e   :  { %v224_v14 = vrot.slane %v219_v7, 2  ;;  %v209_v17 = vrot.slane %v204_v9, 1  ;;  %v254_v19 = vsel %vm208_vm2, %v252_v1, %v253_v2  ;;  %v238_v25 = vrot.slane %v233_v10, 3  ;;  %v1384_v9 = vld [vmem:[#allocation5 + $0x15] ss:$0 sm:$0xff] }
 0x21f   :  { %v199_v16 = vadd.f32 %v1379_v62, %v194_v11  ;;  %v223_v18 = vrot.slane %v218_v12, 2  ;;  %v256_v21 = vadd.f32 %v254_v19, %v247_v8  ;;  %v237_v24 = vrot.slane %v232_v15, 3 }
 0x220   :  { %v211_v23 = vsel %vm208_vm2, %v209_v17, %v210_v13  ;;  %v263_v26 = vsel %vm222_vm3, %v261_v3, %v262_v4  ;;  %v270_v29 = vrot.slane %v266_v22, 3  ;;  %v1717_v52 = vmov 0  }
 0x221   :  { %v213_v27 = vadd.f32 %v211_v23, %v199_v16  ;;  %v265_v28 = vadd.f32 %v263_v26, %v256_v21  ;;  %v225_v30 = vsel %vm222_vm3, %v223_v18, %v224_v14  ;;  %v239_v33 = vsel %vm236_vm4, %v237_v24, %v238_v25  ;;  %1489 = vset.pattern.permute.xlu0 %v1717_v52 }
 0x222   :  { %v272_v32 = vsel %vm236_vm4, %v270_v29, %v271_v20  ;;  %v1719_v58 = vmov 11   ;;  %v1720_v60 = vmov 4   ;;  %v1721_v61 = vmov 8  }
 0x223   :  { %v227_v31 = vadd.f32 %v225_v30, %v213_v27  ;;  %v274_v34 = vadd.f32 %v272_v32, %v265_v28  ;;  %v1722_v62 = vmov 5   ;;  %v1723_v63 = vmov 1  }
 0x224   :  { %v1724_v0 = vmov 13   ;;  %v1725_v1 = vmov 9   ;;  %v2511_v2 = vmov 14   ;;  %v1727_v3 = vmov 2  }
 0x225   :  { %v241_v35 = vadd.f32 %v239_v33, %v227_v31  ;;  %v1381_v36 = vmul.f32 -1.442695, %v274_v34  ;;  %v2512_v4 = vmov 7   ;;  %v1729_v5 = vmov 10  }
 0x226   :  { %v1730_v7 = vmov 3   ;;  %v2514_v8 = vmov 12   ;;  %v2513_v11 = vmov 6   ;;  %v2516_v14 = vmov 15  }
 0x227   :  { %v1380_v37 = vmul.f32 -1.442695, %v241_v35 }
 0x229   :  { %1557 = vpow2.f32 %v1380_v37 }
 0x22a   :  { %1559 = vpow2.f32 %v1381_v36 }
 0x236   :  { %v1558_v38 = vpop.eup %1557 }
 0x237   :  { %v1560_v39 = vpop.eup %1559  ;;  %v281_v40 = vadd.f32 1.0, %v1558_v38 }
 0x238   :  { %v282_v41 = vadd.f32 1.0, %v1560_v39 }
 0x239   :  { %1561 = vrcp.f32 %v281_v40  ;;  %v1953_v40 = vld [vmem:[#allocation5] sm:$0xff] }
 0x23a   :  { %1563 = vrcp.f32 %v282_v41 }
 0x246   :  { %v1562_v42 = vpop.eup %1561 }
 0x247   :  { %v1564_v46 = vpop.eup %1563  ;;  %v1851_v49 = vmul.f32 %v1562_v42, %v241_v35 }
 0x248   :  { %v1853_v50 = vmul.f32 %v1564_v46, %v274_v34 }
 0x249   :  { %2523 = vst [vmem:[#allocation11_spill] sm:$0xff] %v1851_v49  ;;  %1444 = vmatprep.mubr.msk.f32.mxu1 %vm297_vm5, %v1851_v49 }
 0x24a   :  { %2524 = vst [vmem:[#allocation12_spill] sm:$0xff] %v1853_v50  ;;  %1445 = vmatmul.mubr.msk.f32.vlgmr.msra.gmra.mxu1 %vm297_vm5, %v1853_v50 }
 0x30a   :  { %v1860_v53 = vpop.f32.mrf.mxu1 }
 0x30b   :  { %417 = vrot.lane.b32.xlu1 %v1860_v53, %s1718_s2  ;;  %v1891_v13 = vadd.f32 %v1860_v53, %v1384_v9 }
 0x30c   :  { %v370_v54 = vpop.f32.mrf.mxu1 }
 0x30d   :  { %415 = vrot.lane.b32.xlu0 %v370_v54, %s1718_s2  ;;  %v1884_v10 = vadd.f32 %v1384_v9, %v370_v54  ;;  %v388_v16 = vmin.f32 %v1891_v13, 20.0  ;;  %vm386_vm9 = vcmp.gt.f32.partialorder %v1891_v13, 20.0 }
 0x30f   :  { %v387_v12 = vmin.f32 %v1884_v10, 20.0  ;;  %v391_v17 = vmul.f32 1.442695, %v388_v16  ;;  %vm385_vm7 = vcmp.gt.f32.partialorder %v1884_v10, 20.0 }
 0x311   :  { %v389_v15 = vmul.f32 1.442695, %v387_v12 }
 0x313   :  { %1565 = vpow2.f32 %v389_v15 }
 0x314   :  { %1567 = vpow2.f32 %v391_v17 }
 0x320   :  { %v1566_v19 = vpop.eup %1565 }
 0x321   :  { %v393_v20 = vadd.f32 1.0, %v1566_v19  ;;  %v1568_v21 = vpop.eup %1567  ;;  %v396_v23 = vmul.f32 -0.5, %v1566_v19  ;;  %v399_v27 = vand.u32 2147483647, %v1566_v19 }
 0x322   :  { %v402_v22 = vadd.f32 1.0, %v1568_v21  ;;  %v405_v26 = vmul.f32 -0.5, %v1568_v21  ;;  %v408_v32 = vand.u32 2147483647, %v1568_v21 }
 0x323   :  { %1569 = vlog2.f32 %v393_v20  ;;  %v397_v25 = vadd.f32 1.0, %v396_v23  ;;  %vm400_vm6 = vcmp.lt.f32.partialorder %v399_v27, 0.0004427343 }
 0x324   :  { %1571 = vlog2.f32 %v402_v22  ;;  %v406_v31 = vadd.f32 1.0, %v405_v26  ;;  %vm409_vm8 = vcmp.lt.f32.partialorder %v408_v32, 0.0004427343 }
 0x325   :  { %v398_v30 = vmul.f32 %v1566_v19, %v397_v25 }
 0x326   :  { %v407_v35 = vmul.f32 %v1568_v21, %v406_v31 }
 0x330   :  { %v1570_v24 = vpop.eup %1569 }
 0x331   :  { %v395_v28 = vmul.f32 0.6931472, %v1570_v24  ;;  %v1572_v29 = vpop.eup %1571 }
 0x332   :  { %v404_v34 = vmul.f32 0.6931472, %v1572_v29 }
 0x333   :  { %v401_v33 = vsel %vm400_vm6, %v398_v30, %v395_v28  ;;  %v2036_v28 = vsub.s32 4, %v1819_v43 }
 0x334   :  { %v1937_v36 = vsel %vm385_vm7, %v1884_v10, %v401_v33  ;;  %v410_v37 = vsel %vm409_vm8, %v407_v35, %v404_v34 }
 0x335   :  { %v1945_v38 = vrot.slane %v1937_v36, %v1828_v47  ;;  %v1949_v39 = vsel %vm386_vm9, %v1891_v13, %v410_v37  ;;  %v1965_v46 = vrot.slane %v1937_v36, %v1822_v44  ;;  %v1989_v12 = vrot.slane %v1937_v36, %v1825_v45 }
 0x336   :  { %v1961_v42 = vrot.slane %v1949_v39, %v1828_v47  ;;  %v1999_v16 = vrot.slane %v1949_v39, %v1825_v45  ;;  %v2003_v17 = vmul.f32 %v1949_v39, %v1853_v50  ;;  %v2053_v35 = vrot.slane %v1949_v39, %v1831_v48 }
 0x337   :  { %v459_v41 = vmul.f32 %v1945_v38, %v1953_v40  ;;  %v557_v15 = vmul.f32 %v1989_v12, %v1953_v40  ;;  %v2530_v50 = vmov 12  }
 0x338   :  { %v839_v54 = vmul.f32 %v1961_v42, %v1953_v40  ;;  %v933_v21 = vmul.f32 %v1999_v16, %v1953_v40  ;;  %v2021_v23 = vrot.slane %v2003_v17, %v1831_v48 }
 0x339   :  { %v461_v53 = vmul.f32 1.442695, %v459_v41  ;;  %v559_v19 = vmul.f32 1.442695, %v557_v15  ;;  %v2070_v15 = vrot.slane %v1949_v39, %v2036_v28 }
 0x33a   :  { %2525 = vst [vmem:[#allocation13_spill] sm:$0xff] %v2021_v23  ;;  %v935_v29 = vmul.f32 1.442695, %v933_v21  ;;  %v2083_v21 = vrot.slane %v1937_v36, %v2036_v28 }
 0x33b   :  { %1573 = vpow2.f32 %v461_v53 }
 0x348   :  { %v1574_v20 = vpop.eup %1573 }
 0x349   :  { %v465_v25 = vmul.f32 0.0, %v1574_v20 }
 0x37d   :  { %v418_v57 = vpop.permute.xlu1 %417 }
 0x37f   :  { %v416_v56 = vpop.permute.xlu0 %415 }
 0x380   :  { %421 = vxpose.xlu1.b32.start [1/2] (short) (narrow) %v416_v56, 32  ;;  %v510_v56 = vmul.f32 %v1965_v46, %v1953_v40 }
 0x384   :  { %422 = vxpose.xlu1.b32.end [2/2] (short) (narrow) %v418_v57, 32  ;;  %v1977_v57 = vrot.slane %v1949_v39, %v1822_v44 }
 0x386   :  { %v886_v9 = vmul.f32 %v1977_v57, %v1953_v40 }
 0x388   :  { %v888_v13 = vmul.f32 1.442695, %v886_v9 }
 0x3a2   :  { %1496 = vset.pattern.permute.xlu1 %v1719_v58 }
 0x3fc   :  { %v437_v59 = vpop.trf.xlu1 }
 0x3fd   :  { %989 = vperm.xlu1 %1496, %v437_v59   ;;  %469 = vperm.xlu0 %1489, %v437_v59  }
 0x400   :  { %v1876_v6 = vpop.trf.xlu1 }
 0x401   :  { %1497 = vset.pattern.permute.xlu1 %v1720_v60  ;;  %1490 = vset.pattern.permute.xlu0 %v1721_v61 }
 0x402   :  { %660 = vperm.xlu1 %1497, %v437_v59   ;;  %848 = vperm.xlu0 %1490, %v437_v59  }
 0x404   :  { %v1909_v18 = vpop.trf.xlu1 }
 0x406   :  { %1499 = vset.pattern.permute.xlu1 %v1722_v62  ;;  %1491 = vset.pattern.permute.xlu0 %v1723_v63 }
 0x407   :  { %707 = vperm.xlu1 %1499, %v437_v59   ;;  %519 = vperm.xlu0 %1491, %v437_v59  }
 0x408   :  { %v1985_v10 = vpop.trf.xlu1 }
 0x40b   :  { %1500 = vset.pattern.permute.xlu1 %v1724_v0  ;;  %1492 = vset.pattern.permute.xlu0 %v1725_v1 }
 0x40c   :  { %1083 = vperm.xlu1 %1500, %v437_v59   ;;  %895 = vperm.xlu0 %1492, %v437_v59  }
 0x410   :  { %1502 = vset.pattern.permute.xlu1 %v2511_v2  ;;  %1493 = vset.pattern.permute.xlu0 %v1727_v3 }
 0x411   :  { %1130 = vperm.xlu1 %1502, %v437_v59   ;;  %566 = vperm.xlu0 %1493, %v437_v59  }
 0x415   :  { %1503 = vset.pattern.permute.xlu1 %v2512_v4  ;;  %1494 = vset.pattern.permute.xlu0 %v1729_v5 }
 0x416   :  { %801 = vperm.xlu1 %1503, %v437_v59   ;;  %942 = vperm.xlu0 %1494, %v437_v59  }
 0x41a   :  { %1508 = vset.pattern.permute.xlu1 %v1725_v1  ;;  %1495 = vset.pattern.permute.xlu0 %v1730_v7 }
 0x41b   :  { %613 = vperm.xlu0 %1495, %v437_v59   ;;  %899 = vperm.xlu1 %1508, %v1876_v6  }
 0x41f   :  { %1498 = vset.pattern.permute.xlu0 %v2514_v8  ;;  %1513 = vset.pattern.permute.xlu1 %v1720_v60 }
 0x420   :  { %1036 = vperm.xlu0 %1498, %v437_v59   ;;  %664 = vperm.xlu1 %1513, %v1876_v6  }
 0x424   :  { %1501 = vset.pattern.permute.xlu0 %v2513_v11  ;;  %1514 = vset.pattern.permute.xlu1 %v2514_v8 }
 0x425   :  { %754 = vperm.xlu0 %1501, %v437_v59   ;;  %1040 = vperm.xlu1 %1514, %v1876_v6  }
 0x429   :  { %1504 = vset.pattern.permute.xlu0 %v2516_v14  ;;  %1516 = vset.pattern.permute.xlu1 %v1724_v0 }
 0x42a   :  { %1177 = vperm.xlu0 %1504, %v437_v59   ;;  %1087 = vperm.xlu1 %1516, %v1876_v6   ;;  %v841_v59 = vmul.f32 1.442695, %v839_v54 }
 0x42c   :  { %1575 = vpow2.f32 %v841_v59 }
 0x42e   :  { %1505 = vset.pattern.permute.xlu0 %v1717_v52  ;;  %1517 = vset.pattern.permute.xlu1 %v2513_v11 }
 0x42f   :  { %758 = vperm.xlu1 %1517, %v1876_v6   ;;  %474 = vperm.xlu0 %1505, %v1876_v6  }
 0x433   :  { %1519 = vset.pattern.permute.xlu1 %v2512_v4  ;;  %1506 = vset.pattern.permute.xlu0 %v1721_v61 }
 0x434   :  { %805 = vperm.xlu1 %1519, %v1876_v6   ;;  %852 = vperm.xlu0 %1506, %v1876_v6  }
 0x438   :  { %1520 = vset.pattern.permute.xlu1 %v2516_v14  ;;  %1507 = vset.pattern.permute.xlu0 %v1723_v63 }
 0x439   :  { %1181 = vperm.xlu1 %1520, %v1876_v6   ;;  %523 = vperm.xlu0 %1507, %v1876_v6   ;;  %v1576_v30 = vpop.eup %1575 }
 0x43a   :  { %v845_v54 = vmul.f32 0.0, %v1576_v30 }
 0x43d   :  { %1521 = vset.pattern.permute.xlu1 %v1717_v52  ;;  %1509 = vset.pattern.permute.xlu0 %v1727_v3 }
 0x43e   :  { %570 = vperm.xlu0 %1509, %v1876_v6   ;;  %487 = vperm.xlu1 %1521, %v1909_v18  }
 0x442   :  { %1510 = vset.pattern.permute.xlu0 %v1729_v5  ;;  %1523 = vset.pattern.permute.xlu1 %v1727_v3 }
 0x443   :  { %946 = vperm.xlu0 %1510, %v1876_v6   ;;  %582 = vperm.xlu1 %1523, %v1909_v18  }
 0x447   :  { %1511 = vset.pattern.permute.xlu0 %v1730_v7  ;;  %1524 = vset.pattern.permute.xlu1 %v1721_v61 }
 0x448   :  { %617 = vperm.xlu0 %1511, %v1876_v6   ;;  %864 = vperm.xlu1 %1524, %v1909_v18  }
 0x44c   :  { %1512 = vset.pattern.permute.xlu0 %v1719_v58  ;;  %1526 = vset.pattern.permute.xlu1 %v1730_v7 }
 0x44d   :  { %993 = vperm.xlu0 %1512, %v1876_v6   ;;  %629 = vperm.xlu1 %1526, %v1909_v18  }
 0x451   :  { %1515 = vset.pattern.permute.xlu0 %v1722_v62  ;;  %1528 = vset.pattern.permute.xlu1 %v1720_v60 }
 0x452   :  { %711 = vperm.xlu0 %1515, %v1876_v6   ;;  %676 = vperm.xlu1 %1528, %v1909_v18  }
 0x456   :  { %1518 = vset.pattern.permute.xlu0 %v2511_v2  ;;  %1529 = vset.pattern.permute.xlu1 %v1719_v58 }
 0x457   :  { %1134 = vperm.xlu0 %1518, %v1876_v6   ;;  %1005 = vperm.xlu1 %1529, %v1909_v18   ;;  %v512_v6 = vmul.f32 1.442695, %v510_v56 }
 0x459   :  { %1577 = vpow2.f32 %v512_v6  ;;  %v696_v6 = vsub.s32 5, %v1819_v43 }
 0x45a   :  { %1579 = vpow2.f32 %v888_v13 }
 0x45b   :  { %1522 = vset.pattern.permute.xlu0 %v1723_v63  ;;  %1530 = vset.pattern.permute.xlu1 %v1722_v62  ;;  %1581 = vpow2.f32 %v559_v19 }
 0x45c   :  { %535 = vperm.xlu0 %1522, %v1909_v18   ;;  %723 = vperm.xlu1 %1530, %v1909_v18   ;;  %1583 = vpow2.f32 %v935_v29  ;;  %v2088_v29 = vrot.slane %v1937_v36, %v696_v6 }
 0x460   :  { %1525 = vset.pattern.permute.xlu0 %v1725_v1  ;;  %1531 = vset.pattern.permute.xlu1 %v2514_v8 }
 0x461   :  { %911 = vperm.xlu0 %1525, %v1909_v18   ;;  %1052 = vperm.xlu1 %1531, %v1909_v18  }
 0x465   :  { %1527 = vset.pattern.permute.xlu0 %v1729_v5  ;;  %1533 = vset.pattern.permute.xlu1 %v1724_v0 }
 0x466   :  { %958 = vperm.xlu0 %1527, %v1909_v18   ;;  %1099 = vperm.xlu1 %1533, %v1909_v18   ;;  %v1578_v33 = vpop.eup %1577 }
 0x46a   :  { %1532 = vset.pattern.permute.xlu0 %v2513_v11  ;;  %1534 = vset.pattern.permute.xlu1 %v2512_v4 }
 0x46b   :  { %770 = vperm.xlu0 %1532, %v1909_v18   ;;  %817 = vperm.xlu1 %1534, %v1909_v18  }
 0x46f   :  { %1535 = vset.pattern.permute.xlu0 %v2511_v2  ;;  %1536 = vset.pattern.permute.xlu1 %v1717_v52  ;;  %v2007_v52 = vmul.f32 %v1937_v36, %v1851_v49 }
 0x470   :  { %1146 = vperm.xlu0 %1535, %v1909_v18   ;;  %492 = vperm.xlu1 %1536, %v1985_v10  }
 0x471   :  { %v2017_v22 = vrot.slane %v2007_v52, %v1828_v47  ;;  %v2049_v34 = vrot.slane %v2007_v52, %v2036_v28  ;;  %v2076_v19 = vrot.slane %v2007_v52, %v1822_v44  ;;  %v2079_v20 = vrot.slane %v2007_v52, %v696_v6 }
 0x473   :  { %2526 = vst [vmem:[#allocation14_spill] sm:$0xff] %v2079_v20 }
 0x474   :  { %1538 = vset.pattern.permute.xlu0 %v1727_v3  ;;  %1537 = vset.pattern.permute.xlu1 %v1723_v63  ;;  %v2025_v63 = vrot.slane %v1937_v36, %v1831_v48 }
 0x475   :  { %586 = vperm.xlu0 %1538, %v1985_v10   ;;  %539 = vperm.xlu1 %1537, %v1985_v10  }
 0x476   :  { %v604_v32 = vmul.f32 %v2025_v63, %v1953_v40 }
 0x478   :  { %v470_v3 = vpop.permute.xlu0 %469  ;;  %v990_v24 = vpop.permute.xlu1 %989  ;;  %v606_v9 = vmul.f32 1.442695, %v604_v32 }
 0x479   :  { %v481_v26 = vmul.f32 %v2017_v22, %v470_v3  ;;  %v2029_v27 = vmul.f32 %v2021_v23, %v990_v24  ;;  %1541 = vset.pattern.permute.xlu0 %v1730_v7  ;;  %1539 = vset.pattern.permute.xlu1 %v1721_v61  ;;  %v1386_v7 = vmul.f32 -1.442695, %v1840_v55  ;;  %v2045_v61 = vrot.slane %v2003_v17, %v1828_v47 }
 0x47a   :  { %633 = vperm.xlu0 %1541, %v1985_v10   ;;  %868 = vperm.xlu1 %1539, %v1985_v10   ;;  %v1387_v47 = vmul.f32 -1.442695, %v1835_v51 }
 0x47b   :  { %v2038_v31 = vadd.f32 %v481_v26, %v465_v25  ;;  %1585 = vpow2.f32 %v1386_v7 }
 0x47c   :  { %1587 = vpow2.f32 %v606_v9 }
 0x47d   :  { %v849_v37 = vpop.permute.xlu0 %848  ;;  %v661_v41 = vpop.permute.xlu1 %660  ;;  %v516_v53 = vmul.f32 %v1578_v33, %v2038_v31  ;;  %1589 = vpow2.f32 %v1387_v47  ;;  %v1027_v33 = vmul.f32 %v2070_v15, %v1953_v40 }
 0x47e   :  { %v859_v56 = vmul.f32 %v2045_v61, %v849_v37  ;;  %v2058_v59 = vmul.f32 %v2049_v34, %v661_v41  ;;  %1543 = vset.pattern.permute.xlu0 %v1720_v60  ;;  %1540 = vset.pattern.permute.xlu1 %v1725_v1  ;;  %v980_v60 = vmul.f32 %v2053_v35, %v1953_v40  ;;  %v1580_v1 = vpop.eup %1579  ;;  %v2102_v37 = vsub.s32 6, %v1819_v43 }
 0x47f   :  { %680 = vperm.xlu0 %1543, %v1985_v10   ;;  %915 = vperm.xlu1 %1540, %v1985_v10   ;;  %v1582_v41 = vpop.eup %1581 }
 0x480   :  { %v2066_v13 = vadd.f32 %v859_v56, %v845_v54  ;;  %v982_v32 = vmul.f32 1.442695, %v980_v60  ;;  %v2111_v54 = vrot.slane %v2003_v17, %v1822_v44  ;;  %v2114_v56 = vrot.slane %v2003_v17, %v696_v6 }
 0x481   :  { %v2118_v9 = vrot.slane %v1937_v36, %v2102_v37  ;;  %v1029_v44 = vmul.f32 1.442695, %v1027_v33  ;;  %v2148_v33 = vrot.slane %v2003_v17, %v2102_v37 }
 0x482   :  { %v520_v3 = vpop.permute.xlu0 %519  ;;  %v708_v24 = vpop.permute.xlu1 %707  ;;  %v892_v25 = vmul.f32 %v1580_v1, %v2066_v13  ;;  %v698_v1 = vmul.f32 %v2088_v29, %v1953_v40  ;;  %1591 = vpow2.f32 %v982_v32  ;;  %v2144_v32 = vrot.slane %v2007_v52, %v1825_v45 }
 0x483   :  { %v530_v26 = vmul.f32 %v2076_v19, %v520_v3  ;;  %v2091_v30 = vmul.f32 %v2079_v20, %v708_v24  ;;  %1545 = vset.pattern.permute.xlu0 %v1722_v62  ;;  %1542 = vset.pattern.permute.xlu1 %v1729_v5  ;;  %v651_v62 = vmul.f32 %v2083_v21, %v1953_v40  ;;  %1593 = vpow2.f32 %v1029_v44 }
 0x484   :  { %727 = vperm.xlu0 %1545, %v1985_v10   ;;  %962 = vperm.xlu1 %1542, %v1985_v10   ;;  %v2107_v5 = vrot.slane %v1949_v39, %v696_v6  ;;  %v2133_v6 = vrot.slane %v1949_v39, %v2102_v37  ;;  %2529 = vst [vmem:[#allocation17_spill] sm:$0xff] %v2148_v33 }
 0x485   :  { %v2099_v7 = vadd.f32 %v530_v26, %v516_v53  ;;  %v2136_v26 = vsub.s32 7, %v1819_v43  ;;  %v745_v2 = vmul.f32 %v2118_v9, %v1953_v40 }
 0x487   :  { %2527 = vst [vmem:[#allocation15_spill] sm:$0xff] %v2099_v7  ;;  %v896_v47 = vpop.permute.xlu0 %895  ;;  %v1084_v53 = vpop.permute.xlu1 %1083  ;;  %v563_v60 = vmul.f32 %v1582_v41, %v2099_v7  ;;  %v653_v41 = vmul.f32 1.442695, %v651_v62  ;;  %v2531_v7 = vmov 6  }
 0x488   :  { %v906_v3 = vmul.f32 %v2111_v54, %v896_v47  ;;  %v2125_v24 = vmul.f32 %v2114_v56, %v1084_v53  ;;  %1548 = vset.pattern.permute.xlu0 %v1724_v0  ;;  %1544 = vset.pattern.permute.xlu1 %v1719_v58  ;;  %v1074_v0 = vmul.f32 %v2107_v5, %v1953_v40  ;;  %v1584_v58 = vpop.eup %1583 }
 0x489   :  { %1103 = vperm.xlu0 %1548, %v1985_v10   ;;  %1009 = vperm.xlu1 %1544, %v1985_v10   ;;  %v2152_v53 = vrot.slane %v1937_v36, %v2136_v26  ;;  %v1586_v4 = vpop.eup %1585  ;;  %1595 = vpow2.f32 %v653_v41  ;;  %v1121_v36 = vmul.f32 %v2133_v6, %v1953_v40  ;;  %v2179_v41 = vrot.slane %v2007_v52, %v2136_v26 }
 0x48a   :  { %v2138_v47 = vadd.f32 %v906_v3, %v892_v25  ;;  %v700_v3 = vmul.f32 1.442695, %v698_v1  ;;  %v2169_v1 = vrot.slane %v1949_v39, %v2136_v26  ;;  %v1076_v44 = vmul.f32 1.442695, %v1074_v0 }
 0x48c   :  { %2528 = vst [vmem:[#allocation16_spill] sm:$0xff] %v2138_v47  ;;  %v567_v43 = vpop.permute.xlu0 %566  ;;  %v1131_v62 = vpop.permute.xlu1 %1130  ;;  %v939_v25 = vmul.f32 %v1584_v58, %v2138_v47  ;;  %1597 = vpow2.f32 %v700_v3 }
 0x48d   :  { %v577_v11 = vmul.f32 %v2144_v32, %v567_v43  ;;  %v2159_v8 = vmul.f32 %v2148_v33, %v1131_v62  ;;  %1552 = vset.pattern.permute.xlu0 %v2516_v14  ;;  %1546 = vset.pattern.permute.xlu1 %v2530_v50  ;;  %v1588_v43 = vpop.eup %1587  ;;  %v1242_v62 = vadd.f32 1.0, %v1586_v4  ;;  %v2175_v50 = vrot.slane %v2003_v17, %v1825_v45 }
 0x48e   :  { %1197 = vperm.xlu0 %1552, %v1985_v10   ;;  %1056 = vperm.xlu1 %1546, %v1985_v10   ;;  %v792_v14 = vmul.f32 %v2152_v53, %v1953_v40  ;;  %v1590_v49 = vpop.eup %1589  ;;  %1599 = vpow2.f32 %v1076_v44  ;;  %v1168_v33 = vmul.f32 %v2169_v1, %v1953_v40 }
 0x48f   :  { %v2171_v58 = vadd.f32 %v577_v11, %v563_v60  ;;  %v747_v11 = vmul.f32 1.442695, %v745_v2  ;;  %v1123_v60 = vmul.f32 1.442695, %v1121_v36  ;;  %v1243_v20 = vadd.f32 1.0, %v1590_v49  ;;  %v1592_v3 = vpop.eup %1591  ;;  %v2194_v2 = vld [vmem:[#allocation5 + $0x8] sm:$0xff] }
 0x490   :  { %1601 = vrcp.f32 %v1242_v62  ;;  %v794_v36 = vmul.f32 1.442695, %v792_v14  ;;  %v1170_v40 = vmul.f32 1.442695, %v1168_v33  ;;  %v2532_v62 = vmov 7   ;;  %v1594_v33 = vpop.eup %1593 }
 0x491   :  { %v943_v47 = vpop.permute.xlu0 %942  ;;  %v802_v39 = vpop.permute.xlu1 %801  ;;  %v610_v0 = vmul.f32 %v1588_v43, %v2171_v58  ;;  %1603 = vpow2.f32 %v747_v11 }
 0x492   :  { %v953_v4 = vmul.f32 %v2175_v50, %v943_v47  ;;  %v2186_v45 = vmul.f32 %v2179_v41, %v802_v39  ;;  %1547 = vset.pattern.permute.xlu1 %v2531_v7  ;;  %v2198_v47 = vrot.slane %v2007_v52, %v1831_v48  ;;  %1605 = vpow2.f32 %v1123_v60 }
 0x493   :  { %774 = vperm.xlu1 %1547, %v1985_v10   ;;  %v460_v39 = vmul.f32 %v1945_v38, %v2194_v2  ;;  %1607 = vrcp.f32 %v1243_v20  ;;  %v840_v48 = vmul.f32 %v1961_v42, %v2194_v2  ;;  %v1046_v60 = vrot.slane %v2003_v17, %v2036_v28 }
 0x494   :  { %v2192_v23 = vadd.f32 %v953_v4, %v939_v25  ;;  %1609 = vpow2.f32 %v794_v36  ;;  %v887_v28 = vmul.f32 %v1977_v57, %v2194_v2  ;;  %v934_v57 = vmul.f32 %v1999_v16, %v2194_v2 }
 0x495   :  { %1611 = vpow2.f32 %v1170_v40 }
 0x496   :  { %v614_v7 = vpop.permute.xlu0 %613  ;;  %v900_v44 = vpop.permute.xlu1 %899  ;;  %v986_v43 = vmul.f32 %v1592_v3, %v2192_v23  ;;  %v463_v3 = vmul.f32 1.442695, %v460_v39 }
 0x497   :  { %v624_v49 = vmul.f32 %v2198_v47, %v614_v7  ;;  %v2203_v25 = vmul.f32 %v2111_v54, %v900_v44  ;;  %1549 = vset.pattern.permute.xlu1 %v2532_v62  ;;  %v1596_v54 = vpop.eup %1595  ;;  %v2533_v44 = vmov 14   ;;  %v764_v62 = vrot.slane %v2007_v52, %v2102_v37 }
 0x498   :  { %821 = vperm.xlu1 %1549, %v1985_v10   ;;  %v2212_v14 = vadd.f32 %v2029_v27, %v986_v43  ;;  %1613 = vpow2.f32 %v463_v3  ;;  %v890_v52 = vmul.f32 1.442695, %v887_v28 }
 0x499   :  { %v2214_v11 = vadd.f32 %v624_v49, %v610_v0  ;;  %v843_v0 = vmul.f32 1.442695, %v840_v48  ;;  %v1598_v43 = vpop.eup %1597 }
 0x49a   :  { %v1033_v4 = vmul.f32 %v1594_v33, %v2212_v14 }
 0x49b   :  { %v1037_v38 = vpop.permute.xlu0 %1036  ;;  %v665_v20 = vpop.permute.xlu1 %664  ;;  %v657_v7 = vmul.f32 %v1596_v54, %v2214_v11  ;;  %1615 = vpow2.f32 %v843_v0 }
 0x49c   :  { %v1047_v42 = vmul.f32 %v1046_v60, %v1037_v38  ;;  %v2221_v27 = vmul.f32 %v2049_v34, %v665_v20  ;;  %1550 = vset.pattern.permute.xlu1 %v2533_v44  ;;  %v1600_v49 = vpop.eup %1599  ;;  %v2534_v38 = vmov 15   ;;  %1617 = vpow2.f32 %v890_v52 }
 0x49d   :  { %1150 = vperm.xlu1 %1550, %v1985_v10   ;;  %v2228_v36 = vadd.f32 %v2058_v59, %v657_v7  ;;  %v511_v10 = vmul.f32 %v1965_v46, %v2194_v2  ;;  %v1602_v33 = vpop.eup %1601 }
 0x49e   :  { %v2230_v40 = vadd.f32 %v1047_v42, %v1033_v4  ;;  %v1604_v20 = vpop.eup %1603  ;;  %v1248_v7 = vmul.f32 %v1602_v33, %v1840_v55 }
 0x49f   :  { %v704_v34 = vmul.f32 %v1598_v43, %v2228_v36  ;;  %v1606_v3 = vpop.eup %1605  ;;  %v514_v42 = vmul.f32 1.442695, %v511_v10  ;;  %v937_v43 = vmul.f32 1.442695, %v934_v57 }
 0x4a0   :  { %v755_v39 = vpop.permute.xlu0 %754  ;;  %v1041_v48 = vpop.permute.xlu1 %1040  ;;  %v1080_v59 = vmul.f32 %v1600_v49, %v2230_v40 }
 0x4a1   :  { %v765_v54 = vmul.f32 %v764_v62, %v755_v39  ;;  %v2240_v4 = vmul.f32 %v1046_v60, %v1041_v48  ;;  %1551 = vset.pattern.permute.xlu1 %v2534_v38  ;;  %v2244_v37 = vadd.f32 %v2091_v30, %v704_v34  ;;  %v1187_v60 = vrot.slane %v2003_v17, %v2136_v26  ;;  %v1608_v0 = vpop.eup %1607 }
 0x4a2   :  { %1193 = vperm.xlu1 %1551, %v1909_v18   ;;  %v2248_v46 = vadd.f32 %v2125_v24, %v1080_v59  ;;  %v1610_v24 = vpop.eup %1609  ;;  %v558_v17 = vmul.f32 %v1989_v12, %v2194_v2  ;;  %v1249_v48 = vmul.f32 %v1608_v0, %v1835_v51  ;;  %1619 = vpow2.f32 %v514_v42  ;;  %v1267_v51 = vld [vmem:[%s2508_s3 + $0x38] sm:$0xff] }
 0x4a3   :  { %v751_v16 = vmul.f32 %v1604_v20, %v2244_v37  ;;  %v1612_v26 = vpop.eup %1611  ;;  %1621 = vpow2.f32 %v937_v43  ;;  %1447 = vmatprep.subr.mxu0 %v1267_v51  ;;  %v605_v20 = vmul.f32 %v2025_v63, %v2194_v2  ;;  %v652_v43 = vmul.f32 %v2083_v21, %v2194_v2  ;;  %v1266_v63 = vld [vmem:[%s2508_s3 + $0x30] sm:$0xff] }
 0x4a4   :  { %v1127_v44 = vmul.f32 %v1606_v3, %v2248_v46  ;;  %1448 = vmatpush3.msra.mxu0 %v1267_v51 }
 0x4a5   :  { %v1178_v30 = vpop.permute.xlu0 %1177  ;;  %v1088_v28 = vpop.permute.xlu1 %1087  ;;  %v2255_v18 = vadd.f32 %v765_v54, %v751_v16  ;;  %1449 = vmatprep.subr.mxu0 %v1266_v63 }
 0x4a6   :  { %v1188_v49 = vmul.f32 %v1187_v60, %v1178_v30  ;;  %v2258_v34 = vmul.f32 %v2114_v56, %v1088_v28  ;;  %1252 = vrot.lane.b32.xlu1 %v1248_v7, %s1718_s2  ;;  %v2262_v55 = vadd.f32 %v2159_v8, %v1127_v44  ;;  %v561_v8 = vmul.f32 1.442695, %v558_v17  ;;  %v1614_v54 = vpop.eup %1613  ;;  %1450 = vmatpush3.msra.mxu0 %v1266_v63  ;;  %v1264_v17 = vld [vmem:[%s2508_s3 + $0x20] sm:$0xff] }
 0x4a7   :  { %v798_v39 = vmul.f32 %v1610_v24, %v2255_v18  ;;  %v466_v16 = vmul.f32 0.0, %v1614_v54 }
 0x4a8   :  { %v1174_v10 = vmul.f32 %v1612_v26, %v2262_v55  ;;  %v1616_v38 = vpop.eup %1615  ;;  %1623 = vpow2.f32 %v561_v8  ;;  %v1263_v8 = vld [vmem:[%s2508_s3 + $0x18] sm:$0xff] }
 0x4a9   :  { %v2270_v57 = vadd.f32 %v2186_v45, %v798_v39  ;;  %v981_v45 = vmul.f32 %v2053_v35, %v2194_v2  ;;  %v846_v7 = vmul.f32 0.0, %v1616_v38  ;;  %v1618_v30 = vpop.eup %1617 }
 0x4aa   :  { %v475_v56 = vpop.permute.xlu0 %474  ;;  %1254 = vrot.lane.b32.xlu1 %v1249_v48, %s1718_s2  ;;  %v759_v59 = vpop.permute.xlu1 %758  ;;  %v2273_v33 = vadd.f32 %v1188_v49, %v1174_v10  ;;  %v699_v48 = vmul.f32 %v2088_v29, %v2194_v2 }
 0x4ab   :  { %v2275_v12 = vmul.f32 %v764_v62, %v759_v59  ;;  %v482_v52 = vmul.f32 %v2017_v22, %v475_v56  ;;  %v984_v0 = vmul.f32 1.442695, %v981_v45  ;;  %v608_v22 = vmul.f32 1.442695, %v605_v20  ;;  %v1261_v20 = vld [vmem:[%s2508_s3 + $0x8] sm:$0xff] }
 0x4ac   :  { %v655_v59 = vmul.f32 1.442695, %v652_v43  ;;  %v1075_v45 = vmul.f32 %v2107_v5, %v2194_v2  ;;  %v746_v5 = vmul.f32 %v2118_v9, %v2194_v2  ;;  %v793_v9 = vmul.f32 %v2152_v53, %v2194_v2 }
 0x4ad   :  { %v2289_v28 = vadd.f32 %v482_v52, %v466_v16  ;;  %1625 = vpow2.f32 %v984_v0 }
 0x4ae   :  { %1627 = vpow2.f32 %v608_v22  ;;  %v749_v63 = vmul.f32 1.442695, %v746_v5 }
 0x4af   :  { %v853_v3 = vpop.permute.xlu0 %852  ;;  %v806_v62 = vpop.permute.xlu1 %805  ;;  %1629 = vpow2.f32 %v655_v59 }
 0x4b0   :  { %v860_v42 = vmul.f32 %v2045_v61, %v853_v3  ;;  %v2287_v44 = vmul.f32 %v2179_v41, %v806_v62  ;;  %v1265_v61 = vld [vmem:[%s2508_s3 + $0x28] sm:$0xff]  ;;  %v1620_v26 = vpop.eup %1619 }
 0x4b1   :  { %1451 = vmatprep.subr.mxu0 %v1265_v61  ;;  %v517_v10 = vmul.f32 %v1620_v26, %v2289_v28 }
 0x4b2   :  { %v2291_v35 = vadd.f32 %v860_v42, %v846_v7  ;;  %1452 = vmatpush3.msra.mxu0 %v1265_v61  ;;  %v1078_v42 = vmul.f32 1.442695, %v1075_v45 }
 0x4b3   :  { %1453 = vmatprep.subr.mxu0 %v1264_v17 }
 0x4b4   :  { %v893_v41 = vmul.f32 %v1618_v30, %v2291_v35  ;;  %v524_v24 = vpop.permute.xlu0 %523  ;;  %v1182_v49 = vpop.permute.xlu1 %1181  ;;  %1454 = vmatpush3.msra.mxu0 %v1264_v17 }
 0x4b5   :  { %v531_v21 = vmul.f32 %v2076_v19, %v524_v24  ;;  %v2306_v39 = vmul.f32 %v1187_v60, %v1182_v49  ;;  %v1622_v19 = vpop.eup %1621  ;;  %v1028_v60 = vmul.f32 %v2070_v15, %v2194_v2  ;;  %1455 = vmatprep.subr.mxu0 %v1263_v8  ;;  %v702_v15 = vmul.f32 1.442695, %v699_v48 }
 0x4b6   :  { %v2312_v56 = vadd.f32 %v2203_v25, %v893_v41  ;;  %v1262_v25 = vld [vmem:[%s2508_s3 + $0x10] sm:$0xff]  ;;  %1456 = vmatpush3.msra.mxu0 %v1263_v8  ;;  %v1624_v3 = vpop.eup %1623 }
 0x4b7   :  { %v2319_v51 = vadd.f32 %v531_v21, %v517_v10  ;;  %v1031_v62 = vmul.f32 1.442695, %v1028_v60  ;;  %1457 = vmatprep.subr.mxu0 %v1262_v25  ;;  %1631 = vpow2.f32 %v702_v15  ;;  %v796_v21 = vmul.f32 1.442695, %v793_v9 }
 0x4b8   :  { %v940_v29 = vmul.f32 %v1622_v19, %v2312_v56  ;;  %1458 = vmatpush3.msra.mxu0 %v1262_v25 }
 0x4b9   :  { %v571_v54 = vpop.permute.xlu0 %570  ;;  %v488_v38 = vpop.permute.xlu1 %487  ;;  %v564_v7 = vmul.f32 %v1624_v3, %v2319_v51  ;;  %1459 = vmatprep.subr.mxu0 %v1261_v20  ;;  %1633 = vpow2.f32 %v1031_v62  ;;  %v2536_v62 = vld [vmem:[#allocation14_spill] sm:$0xff] }
 0x4ba   :  { %v2328_v52 = vmul.f32 %v488_v38, %v2038_v31  ;;  %v578_v16 = vmul.f32 %v2144_v32, %v571_v54  ;;  %v1260_v31 = vld [vmem:[%s2508_s3] sm:$0xff]  ;;  %1460 = vmatpush3.msra.mxu0 %v1261_v20  ;;  %v1122_v32 = vmul.f32 %v2133_v6, %v2194_v2  ;;  %v1626_v41 = vpop.eup %1625  ;;  %1635 = vpow2.f32 %v1078_v42  ;;  %s1734_s3 = smov [#allocation7]  }
 0x4bb   :  { %1461 = vmatprep.subr.mxu0 %v1260_v31  ;;  %v1628_v24 = vpop.eup %1627  ;;  %v1169_v6 = vmul.f32 %v2169_v1, %v2194_v2  ;;  %1637 = vpow2.f32 %v749_v63  ;;  %v2535_v1 = vld [vmem:[#allocation13_spill] sm:$0xff]  ;;  %s1362_s16 = sshll.u32 %s1734_s3, 4  ;;  %s1363_s16 = int_to_ptr.vmem [resolvable:$true] %s1362_s16 }
 0x4bc   :  { %v2347_v43 = vadd.f32 %v578_v16, %v564_v7  ;;  %1462 = vmatpush3.msra.mxu0 %v1260_v31  ;;  %v1125_v26 = vmul.f32 1.442695, %v1122_v32  ;;  %v1630_v8 = vpop.eup %1629  ;;  %s1687_s17 = scalar_lea.vmem %s1363_s16, 256  ;;  %p1692_p11 = scmp.lt.s32.totalorder %s1363_s16, %s1363_s16 }
 0x4bd   :  { %v1172_v19 = vmul.f32 1.442695, %v1169_v6  ;;  %p1688_p10 = scmp.ne.s32.totalorder %s1363_s16, %s1687_s17  ;;  %p1693_p12 = scmp.lt.s32.totalorder %s1687_s17, %s1687_s17 }
 0x4be   :  { %v947_v0 = vpop.permute.xlu0 %946  ;;  %v2340_v30 = vpop.permute.xlu1 %582  ;;  %v611_v10 = vmul.f32 %v1628_v24, %v2347_v43  ;;  %1639 = vpow2.f32 %v1125_v26 }
 0x4bf   :  { %v954_v22 = vmul.f32 %v2175_v50, %v947_v0  ;;  %1641 = vpow2.f32 %v796_v21  ;;  %p1694_p13 = por %p1693_p12, %p1692_p11 }
 0x4c0   :  { %1643 = vpow2.f32 %v1172_v19 }
 0x4c1   :  { %v2349_v61 = vadd.f32 %v954_v22, %v940_v29  ;;  %p1695_p0 = pnand %p1694_p13, %p1688_p10 }
 0x4c3   :  { %v618_v49 = vpop.permute.xlu0 %617  ;;  %v865_v17 = vpop.permute.xlu1 %864  ;;  %v987_v50 = vmul.f32 %v1626_v41, %v2349_v61 }
 0x4c4   :  { %v625_v53 = vmul.f32 %v2198_v47, %v618_v49  ;;  %v2356_v48 = vmul.f32 %v865_v17, %v2066_v13  ;;  %v1632_v13 = vpop.eup %1631  ;;  %v2537_v49 = vld [vmem:[#allocation17_spill] sm:$0xff] }
 0x4c6   :  { %v2359_v59 = vadd.f32 %v625_v53, %v611_v10  ;;  %v1634_v38 = vpop.eup %1633 }
 0x4c7   :  { %v1636_v7 = vpop.eup %1635 }
 0x4c8   :  { %v994_v60 = vpop.permute.xlu0 %993  ;;  %v630_v29 = vpop.permute.xlu1 %629  ;;  %v658_v25 = vmul.f32 %v1630_v8, %v2359_v59 }
 0x4c9   :  { %v1001_v2 = vmul.f32 %v2535_v1, %v994_v60 }
 0x4ca   :  { %v2364_v47 = vadd.f32 %v2221_v27, %v658_v25  ;;  %v1638_v27 = vpop.eup %1637 }
 0x4cb   :  { %v2366_v54 = vadd.f32 %v1001_v2, %v987_v50  ;;  %v1640_v63 = vpop.eup %1639 }
 0x4cc   :  { %v705_v45 = vmul.f32 %v1632_v13, %v2364_v47  ;;  %v1642_v24 = vpop.eup %1641 }
 0x4cd   :  { %v1034_v15 = vmul.f32 %v1634_v38, %v2366_v54  ;;  %v712_v20 = vpop.permute.xlu0 %711  ;;  %v677_v3 = vpop.permute.xlu1 %676 }
 0x4ce   :  { %v719_v16 = vmul.f32 %v2536_v62, %v712_v20  ;;  %v1644_v53 = vpop.eup %1643  ;;  %v2538_v20 = vld [vmem:[#allocation15_spill] sm:$0xff] }
 0x4cf   :  { %v2372_v5 = vadd.f32 %v2240_v4, %v1034_v15 }
 0x4d0   :  { %v2374_v31 = vadd.f32 %v719_v16, %v705_v45  ;;  %v497_v45 = vsel %vm297_vm5, %v2328_v52, 0.0 }
 0x4d1   :  { %v1081_v42 = vmul.f32 %v1636_v7, %v2372_v5 }
 0x4d2   :  { %v1135_v0 = vpop.permute.xlu0 %1134  ;;  %v1006_v22 = vpop.permute.xlu1 %1005  ;;  %v752_v32 = vmul.f32 %v1638_v27, %v2374_v31 }
 0x4d3   :  { %v2379_v9 = vadd.f32 %v2258_v34, %v1081_v42  ;;  %v1142_v17 = vmul.f32 %v2537_v49, %v1135_v0 }
 0x4d4   :  { %v2382_v41 = vadd.f32 %v2275_v12, %v752_v32 }
 0x4d5   :  { %v1128_v4 = vmul.f32 %v1640_v63, %v2379_v9  ;;  %v636_v63 = vmul.f32 %v630_v29, %v2214_v11 }
 0x4d6   :  { %v799_v50 = vmul.f32 %v1642_v24, %v2382_v41 }
 0x4d7   :  { %v2387_v26 = vadd.f32 %v1142_v17, %v1128_v4  ;;  %v536_v6 = vpop.permute.xlu0 %535  ;;  %v724_v21 = vpop.permute.xlu1 %723  ;;  %v683_v17 = vmul.f32 %v677_v3, %v2228_v36 }
 0x4d8   :  { %v2390_v10 = vadd.f32 %v2287_v44, %v799_v50  ;;  %v542_v62 = vmul.f32 %v536_v6, %v2538_v20  ;;  %v1012_v50 = vmul.f32 %v1006_v22, %v2212_v14 }
 0x4d9   :  { %v1175_v34 = vmul.f32 %v1644_v53, %v2387_v26 }
 0x4da   :  { %v544_v52 = vsel %vm297_vm5, %v542_v62, 0.0 }
 0x4db   :  { %v2394_v12 = vadd.f32 %v2306_v39, %v1175_v34  ;;  %v589_v39 = vmul.f32 %v2340_v30, %v2171_v58 }
 0x4dc   :  { %v912_v8 = vpop.permute.xlu0 %911  ;;  %v1053_v19 = vpop.permute.xlu1 %1052 }
 0x4e1   :  { %v2396_v60 = vpop.permute.xlu0 %958  ;;  %v2398_v25 = vpop.permute.xlu1 %1099 }
 0x4e6   :  { %v2400_v1 = vpop.permute.xlu0 %770  ;;  %v2402_v2 = vpop.permute.xlu1 %817 }
 0x4eb   :  { %v2404_v13 = vpop.permute.xlu0 %1146  ;;  %v493_v38 = vpop.permute.xlu1 %492 }
 0x4ec   :  { %v496_v44 = vmul.f32 %v493_v38, %v2289_v28  ;;  %v591_v28 = vsel %vm297_vm5, %v589_v39, 0.0  ;;  %v2539_v39 = vld [vmem:[#allocation16_spill] sm:$0xff] }
 0x4ed   :  { %v918_v36 = vmul.f32 %v912_v8, %v2539_v39  ;;  %v1059_v8 = vmul.f32 %v1053_v19, %v2230_v40 }
 0x4ee   :  { %v498_v15 = vsel %vm297_vm5, %v496_v44, 0.0  ;;  %v873_v44 = vsel %vm297_vm5, %v2356_v48, 0.0 }
 0x4ef   :  { %v499_v16 = vadd.f32 %v498_v15, %v497_v45  ;;  %v638_v45 = vsel %vm297_vm5, %v636_v63, 0.0  ;;  %v685_v15 = vsel %vm297_vm5, %v683_v17, 0.0  ;;  %v920_v63 = vsel %vm297_vm5, %v918_v36, 0.0 }
 0x4f0   :  { %v587_v7 = vpop.permute.xlu0 %586  ;;  %v540_v27 = vpop.permute.xlu1 %539  ;;  %v1061_v36 = vsel %vm297_vm5, %v1059_v8, 0.0 }
 0x4f1   :  { %v500_v42 = vrot.slane %v499_v16, 4  ;;  %v590_v0 = vmul.f32 %v587_v7, %v2347_v43  ;;  %v543_v32 = vmul.f32 %v540_v27, %v2319_v51  ;;  %v730_v43 = vmul.f32 %v724_v21, %v2244_v37 }
 0x4f3   :  { %v501_v24 = vadd.f32 %v500_v42, %v499_v16  ;;  %v592_v58 = vsel %vm297_vm5, %v590_v0, 0.0  ;;  %v545_v30 = vsel %vm297_vm5, %v543_v32, 0.0  ;;  %v732_v48 = vsel %vm297_vm5, %v730_v43, 0.0 }
 0x4f4   :  { %v593_v4 = vadd.f32 %v592_v58, %v591_v28  ;;  %v546_v49 = vadd.f32 %v545_v30, %v544_v52  ;;  %v965_v30 = vmul.f32 %v2396_v60, %v2192_v23 }
 0x4f5   :  { %v502_v51 = vrot.slane %v501_v24, 2  ;;  %v634_v6 = vpop.permute.xlu0 %633  ;;  %v869_v53 = vpop.permute.xlu1 %868 }
 0x4f6   :  { %v594_v34 = vrot.slane %v593_v4, 4  ;;  %v547_v11 = vrot.slane %v546_v49, 4  ;;  %v637_v29 = vmul.f32 %v634_v6, %v2359_v59  ;;  %v872_v38 = vmul.f32 %v869_v53, %v2291_v35 }
 0x4f7   :  { %v503_v3 = vadd.f32 %v502_v51, %v501_v24  ;;  %v2433_v59 = vsel %vm297_vm5, %v1012_v50, 0.0 }
 0x4f8   :  { %v595_v14 = vadd.f32 %v594_v34, %v593_v4  ;;  %v548_v37 = vadd.f32 %v547_v11, %v546_v49  ;;  %v639_v22 = vsel %vm297_vm5, %v637_v29, 0.0  ;;  %v874_v21 = vsel %vm297_vm5, %v872_v38, 0.0 }
 0x4f9   :  { %v640_v35 = vadd.f32 %v639_v22, %v638_v45  ;;  %v875_v20 = vadd.f32 %v874_v21, %v873_v44  ;;  %v504_v42 = vrot.slane %v503_v3, 1  ;;  %v1106_v22 = vmul.f32 %v2398_v25, %v2248_v46 }
 0x4fa   :  { %v596_v62 = vrot.slane %v595_v14, 2  ;;  %v549_v16 = vrot.slane %v548_v37, 2  ;;  %v681_v7 = vpop.permute.xlu0 %680  ;;  %v916_v27 = vpop.permute.xlu1 %915 }
 0x4fb   :  { %v641_v0 = vrot.slane %v640_v35, 4  ;;  %v876_v32 = vrot.slane %v875_v20, 4  ;;  %v684_v28 = vmul.f32 %v681_v7, %v2364_v47  ;;  %v919_v58 = vmul.f32 %v916_v27, %v2312_v56 }
 0x4fc   :  { %v597_v52 = vadd.f32 %v596_v62, %v595_v14  ;;  %v550_v24 = vadd.f32 %v549_v16, %v548_v37  ;;  %v505_v51 = vadd.f32 %v504_v42, %v503_v3 }
 0x4fd   :  { %v642_v4 = vadd.f32 %v641_v0, %v640_v35  ;;  %v877_v40 = vadd.f32 %v876_v32, %v875_v20  ;;  %v686_v19 = vsel %vm297_vm5, %v684_v28, 0.0  ;;  %v921_v43 = vsel %vm297_vm5, %v919_v58, 0.0 }
 0x4fe   :  { %v598_v49 = vrot.slane %v597_v52, 1  ;;  %v551_v17 = vrot.slane %v550_v24, 1  ;;  %v687_v50 = vadd.f32 %v686_v19, %v685_v15  ;;  %v922_v53 = vadd.f32 %v921_v43, %v920_v63 }
 0x4ff   :  { %v643_v47 = vrot.slane %v642_v4, 2  ;;  %v878_v6 = vrot.slane %v877_v40, 2  ;;  %v728_v34 = vpop.permute.xlu0 %727  ;;  %v963_v11 = vpop.permute.xlu1 %962 }
 0x500   :  { %v599_v29 = vadd.f32 %v598_v49, %v597_v52  ;;  %v552_v56 = vadd.f32 %v551_v17, %v550_v24  ;;  %v688_v38 = vrot.slane %v687_v50, 4  ;;  %v731_v23 = vmul.f32 %v728_v34, %v2374_v31 }
 0x501   :  { %v644_v60 = vadd.f32 %v643_v47, %v642_v4  ;;  %v879_v44 = vadd.f32 %v878_v6, %v877_v40  ;;  %v923_v45 = vrot.slane %v922_v53, 4  ;;  %v966_v39 = vmul.f32 %v963_v11, %v2349_v61 }
 0x502   :  { %v1212_v3 = vsel %vm1211_vm10, %v505_v51, %v552_v56  ;;  %v689_v14 = vadd.f32 %v688_v38, %v687_v50  ;;  %v733_v37 = vsel %vm297_vm5, %v731_v23, 0.0  ;;  %v967_v31 = vsel %vm297_vm5, %v965_v30, 0.0 }
 0x503   :  { %v645_v21 = vrot.slane %v644_v60, 1  ;;  %v924_v15 = vadd.f32 %v923_v45, %v922_v53  ;;  %v734_v35 = vadd.f32 %v733_v37, %v732_v48  ;;  %v968_v62 = vsel %vm297_vm5, %v966_v39, 0.0 }
 0x504   :  { %v690_v20 = vrot.slane %v689_v14, 2  ;;  %v1104_v61 = vpop.permute.xlu0 %1103  ;;  %v1010_v16 = vpop.permute.xlu1 %1009  ;;  %v1214_v8 = vsel %vm1213_vm11, %v1212_v3, %v599_v29  ;;  %v880_v27 = vrot.slane %v879_v44, 1  ;;  %v969_v28 = vadd.f32 %v968_v62, %v967_v31 }
 0x505   :  { %v646_v7 = vadd.f32 %v645_v21, %v644_v60  ;;  %v925_v42 = vrot.slane %v924_v15, 2  ;;  %v735_v0 = vrot.slane %v734_v35, 4  ;;  %v1107_v46 = vmul.f32 %v1104_v61, %v2379_v9 }
 0x506   :  { %v691_v32 = vadd.f32 %v690_v20, %v689_v14  ;;  %v1013_v25 = vmul.f32 %v1010_v16, %v2366_v54  ;;  %v1108_v48 = vsel %vm297_vm5, %v1106_v22, 0.0  ;;  %v970_v30 = vrot.slane %v969_v28, 4 }
 0x507   :  { %v926_v63 = vadd.f32 %v925_v42, %v924_v15  ;;  %v736_v52 = vadd.f32 %v735_v0, %v734_v35  ;;  %v1215_v24 = vsel %vm188_vm1, %v1214_v8, %v646_v7  ;;  %v1109_v4 = vsel %vm297_vm5, %v1107_v46, 0.0 }
 0x508   :  { %v692_v58 = vrot.slane %v691_v32, 1  ;;  %v1015_v40 = vsel %vm297_vm5, %v1013_v25, 0.0  ;;  %v1110_v17 = vadd.f32 %v1109_v4, %v1108_v48  ;;  %v881_v43 = vadd.f32 %v880_v27, %v879_v44 }
 0x509   :  { %v927_v19 = vrot.slane %v926_v63, 1  ;;  %v737_v49 = vrot.slane %v736_v52, 2  ;;  %v1016_v50 = vadd.f32 %v1015_v40, %v2433_v59  ;;  %v1057_v9 = vpop.permute.xlu1 %1056  ;;  %v971_v51 = vadd.f32 %v970_v30, %v969_v28  ;;  %v1198_v40 = vpop.permute.xlu0 %1197 }
 0x50a   :  { %v693_v54 = vadd.f32 %v692_v58, %v691_v32  ;;  %v1060_v47 = vmul.f32 %v1057_v9, %v2372_v5  ;;  %v1111_v34 = vrot.slane %v1110_v17, 4  ;;  %v777_v29 = vmul.f32 %v2400_v1, %v2255_v18 }
 0x50b   :  { %v928_v6 = vadd.f32 %v927_v19, %v926_v63  ;;  %v738_v53 = vadd.f32 %v737_v49, %v736_v52  ;;  %v1017_v11 = vrot.slane %v1016_v50, 4  ;;  %v972_v56 = vrot.slane %v971_v51, 2 }
 0x50c   :  { %v1062_v38 = vsel %vm297_vm5, %v1060_v47, 0.0  ;;  %v1217_v23 = vsel %vm1216_vm12, %v1215_v24, %v693_v54  ;;  %v1112_v44 = vadd.f32 %v1111_v34, %v1110_v17  ;;  %v779_v1 = vsel %vm297_vm5, %v777_v29, 0.0 }
 0x50d   :  { %v1221_v59 = vsel %vm1211_vm10, %v881_v43, %v928_v6  ;;  %v739_v60 = vrot.slane %v738_v53, 1  ;;  %v1018_v45 = vadd.f32 %v1017_v11, %v1016_v50  ;;  %v973_v39 = vadd.f32 %v972_v56, %v971_v51 }
 0x50e   :  { %v1063_v3 = vadd.f32 %v1062_v38, %v1061_v36  ;;  %v775_v5 = vpop.permute.xlu1 %774  ;;  %v1113_v37 = vrot.slane %v1112_v44, 2  ;;  %v824_v62 = vmul.f32 %v2402_v2, %v2270_v57  ;;  %v1153_v57 = vmul.f32 %v2404_v13, %v2262_v55 }
 0x50f   :  { %v740_v14 = vadd.f32 %v739_v60, %v738_v53  ;;  %v1019_v22 = vrot.slane %v1018_v45, 2  ;;  %v778_v21 = vmul.f32 %v775_v5, %v2382_v41  ;;  %v974_v15 = vrot.slane %v973_v39, 1 }
 0x510   :  { %v1064_v18 = vrot.slane %v1063_v3, 4  ;;  %v1114_v8 = vadd.f32 %v1113_v37, %v1112_v44  ;;  %v826_v46 = vsel %vm297_vm5, %v824_v62, 0.0  ;;  %v1155_v50 = vsel %vm297_vm5, %v1153_v57, 0.0  ;;  %v2540_v37 = vld [vmem:[#allocation11_spill] sm:$0xff] }
 0x511   :  { %v1020_v35 = vadd.f32 %v1019_v22, %v1018_v45  ;;  %v780_v31 = vsel %vm297_vm5, %v778_v21, 0.0  ;;  %v1218_v20 = vsel %vm236_vm4, %v1217_v23, %v740_v14  ;;  %v975_v61 = vadd.f32 %v974_v15, %v973_v39 }
 0x512   :  { %v1065_v36 = vadd.f32 %v1064_v18, %v1063_v3  ;;  %v781_v16 = vadd.f32 %v780_v31, %v779_v1  ;;  %v1115_v2 = vrot.slane %v1114_v8, 1  ;;  %v1201_v55 = vmul.f32 %v1198_v40, %v2394_v12  ;;  %v1385_v3 = vld [vmem:[#allocation5 + $0x16] ss:$0 sm:$0xff] }
 0x513   :  { %v1021_v7 = vrot.slane %v1020_v35, 1  ;;  %v822_v27 = vpop.permute.xlu1 %821  ;;  %v1222_v41 = vsel %vm1213_vm11, %v1221_v59, %v975_v61  ;;  %v1232_v22 = vmul.f32 %v1385_v3, %v2540_v37 }
 0x514   :  { %v1066_v42 = vrot.slane %v1065_v36, 2  ;;  %v782_v0 = vrot.slane %v781_v16, 4  ;;  %v825_v32 = vmul.f32 %v822_v27, %v2390_v10  ;;  %v1116_v9 = vadd.f32 %v1115_v2, %v1114_v8  ;;  %v2541_v8 = vld [vmem:[#allocation12_spill] sm:$0xff]  ;;  %v1646_v2 = vld [vmem:[#allocation2] sm:$0xff] }
 0x515   :  { %v1022_v28 = vadd.f32 %v1021_v7, %v1020_v35  ;;  %v1203_v38 = vsel %vm297_vm5, %v1201_v55, 0.0  ;;  %v1233_v7 = vmul.f32 %v1385_v3, %v2541_v8 }
 0x516   :  { %v1067_v25 = vadd.f32 %v1066_v42, %v1065_v36  ;;  %v783_v48 = vadd.f32 %v782_v0, %v781_v16  ;;  %v827_v63 = vsel %vm297_vm5, %v825_v32, 0.0  ;;  %v1388_v32 = vld [vmem:[#allocation5 + $0x19] ss:$0 sm:$0xff] }
 0x517   :  { %v828_v52 = vadd.f32 %v827_v63, %v826_v46  ;;  %v1223_v24 = vsel %vm188_vm1, %v1222_v41, %v1022_v28 }
 0x518   :  { %v1068_v58 = vrot.slane %v1067_v25, 1  ;;  %v784_v30 = vrot.slane %v783_v48, 2  ;;  %v1151_v4 = vpop.permute.xlu1 %1150 }
 0x519   :  { %v829_v19 = vrot.slane %v828_v52, 4  ;;  %v1154_v10 = vmul.f32 %v1151_v4, %v2387_v26 }
 0x51a   :  { %v1069_v49 = vadd.f32 %v1068_v58, %v1067_v25  ;;  %v785_v17 = vadd.f32 %v784_v30, %v783_v48  ;;  %v1645_v48 = vld [vmem:[#allocation2 + $0x8] sm:$0xff] }
 0x51b   :  { %v830_v43 = vadd.f32 %v829_v19, %v828_v52  ;;  %v1156_v54 = vsel %vm297_vm5, %v1154_v10, 0.0 }
 0x51c   :  { %v786_v13 = vrot.slane %v785_v17, 1  ;;  %v1157_v51 = vadd.f32 %v1156_v54, %v1155_v50  ;;  %v1224_v47 = vsel %vm1216_vm12, %v1223_v24, %v1069_v49 }
 0x51d   :  { %v831_v6 = vrot.slane %v830_v43, 2  ;;  %v1194_v53 = vpop.permute.xlu1 %1193  ;;  %v1225_v34 = vsel %vm236_vm4, %v1224_v47, %v1116_v9 }
 0x51e   :  { %v787_v11 = vadd.f32 %v786_v13, %v785_v17  ;;  %v1158_v26 = vrot.slane %v1157_v51, 4  ;;  %v1200_v29 = vmul.f32 %v1194_v53, %v2273_v33 }
 0x51f   :  { %v832_v56 = vadd.f32 %v831_v6, %v830_v43 }
 0x520   :  { %v1159_v23 = vadd.f32 %v1158_v26, %v1157_v51  ;;  %v1202_v59 = vsel %vm297_vm5, %v1200_v29, 0.0  ;;  %v1219_v12 = vsel %vm222_vm3, %v1218_v20, %v787_v11 }
 0x521   :  { %v833_v60 = vrot.slane %v832_v56, 1  ;;  %v1204_v44 = vadd.f32 %v1203_v38, %v1202_v59  ;;  %v1253_v35 = vpop.permute.xlu1 %1252 }
 0x522   :  { %v1160_v45 = vrot.slane %v1159_v23, 2 }
 0x523   :  { %v1205_v39 = vrot.slane %v1204_v44, 4  ;;  %v834_v5 = vadd.f32 %v833_v60, %v832_v56 }
 0x524   :  { %v1161_v14 = vadd.f32 %v1160_v45, %v1159_v23 }
 0x525   :  { %v1206_v21 = vadd.f32 %v1205_v39, %v1204_v44  ;;  %v1220_v33 = vsel %vm208_vm2, %v1219_v12, %v834_v5  ;;  %v1255_v42 = vpop.permute.xlu1 %1254 }
 0x526   :  { %v1162_v15 = vrot.slane %v1161_v14, 1  ;;  %v1234_v18 = vadd.f32 %v1232_v22, %v1220_v33 }
 0x527   :  { %v1207_v1 = vrot.slane %v1206_v21, 2 }
 0x528   :  { %v1163_v31 = vadd.f32 %v1162_v15, %v1161_v14  ;;  %v1258_v62 = vmul.f32 %v1253_v35, %v1234_v18 }
 0x529   :  { %v1208_v61 = vadd.f32 %v1207_v1, %v1206_v21 }
 0x52a   :  { %v1226_v20 = vsel %vm222_vm3, %v1225_v34, %v1163_v31  ;;  %1463 = vmatprep.mubr.msk.f32.mxu0 %vm297_vm5, %v1258_v62 }
 0x52b   :  { %v1209_v36 = vrot.slane %v1208_v61, 1 }
 0x52d   :  { %v1210_v16 = vadd.f32 %v1209_v36, %v1208_v61 }
 0x52f   :  { %v1227_v27 = vsel %vm208_vm2, %v1226_v20, %v1210_v16 }
 0x530   :  { %v1235_v41 = vadd.f32 %v1233_v7, %v1227_v27 }
 0x532   :  { %v1259_v0 = vmul.f32 %v1255_v42, %v1235_v41 }
 0x534   :  { %1464 = vmatmul.mubr.msk.f32.vlgmr.msra.gmra.mxu0 %vm297_vm5, %v1259_v0 }
 0x5f4   :  { %v1465_v28 = vpop.f32.mrf.mxu0 }
 0x5f5   :  { %v1350_v46 = vadd.f32 %v1465_v28, %v1388_v32 }
 0x5f6   :  { %v1344_v25 = vpop.f32.mrf.mxu0 }
 0x5f7   :  { %v1354_v63 = vadd.f32 %v1645_v48, %v1350_v46  ;;  %v1345_v57 = vadd.f32 %v1388_v32, %v1344_v25 }
 0x5f9   :  { %1356 = vst.msk [vmem:[#allocation7 + $0x8] sm:$0xff] %vm60_vm0, %v1354_v63  ;;  %v1353_v52 = vadd.f32 %v1646_v2, %v1345_v57 }
 0x5fb   :  { %1355 = vst.msk [vmem:[#allocation7] sm:$0xff] %vm60_vm0, %v1353_v52 }
 0x5fc   :  { %1698 = shalt.err (!%p1695_p0)
}
 0x5fd   :  { %1368 = dma.vmem_to_hbm [thread:$0]  %s1363_s16, 256, %s2510_s5, [#allocation4], %s1714_s21, %s1714_s21, %s1715_s22  }
 0x5fe   :  { %1711 = dma.done.wait [#allocation4], 256  }
 0x5ff   :  { %1712 = vsyncadd [#allocation4], 4294967040 }
 0x600   :  { %1372 = vsyncpa [#allocation3], 1 }
 0x601   :  { %1373 = vsyncpa [#allocation6], 1 }
 0x602   :  { %1374 = vsyncpa [#allocation4], 1 }

</bundles_post_ra>
